<compile_context>
chip_gen: v5e
topology: v5e:2x2
jax: 0.10.0
libtpu: 0.0.40
codegen_flags: <defaults>
</compile_context>

<pallas_src>
import jax
import jax.numpy as jnp
from jax.experimental import pallas as pl
from jax.experimental.pallas import tpu as pltpu


# ----------------------------- Pallas GRU kernel -----------------------------
def gru_kernel(tok_ref, embwx_ref, whh_ref, bx_ref, bhn_ref, out_ref):
    """Whole GRU forward in one invocation (no grid).

    tok_ref  : (T*B, 1)   int32 token ids, TIME-MAJOR (row = t*B + b)
    embwx_ref: (V, 3*GP)  embedding table pre-multiplied by gate-padded W_ih
    whh_ref  : (H, 3*GP)  gate-padded hidden->gate weights (h @ U)
    bx_ref   : (1, 3*GP)  folded biases [b_ih_r+b_hh_r | b_ih_z+b_hh_z | b_ih_n]
    bhn_ref  : (1, H)     b_hh_n (stays inside the r*(...) term, PyTorch semantics)
    out_ref  : (B, T*H)   outputs, h_t stored at lanes [t*H:(t+1)*H]
    Gate order follows PyTorch nn.GRU: (r, z, n); each gate starts at lane g*GP.
    """
    TB = tok_ref.shape[0]
    V, GP3 = embwx_ref.shape
    GP = GP3 // 3
    H = bhn_ref.shape[1]
    B = out_ref.shape[0]
    T = TB // B

    # ---- Hoisted embedding lookup + input projection (single big MXU push) ----
    # One-hot row-select on the MXU; completely OFF the serial recurrence.
    iota_v = jax.lax.broadcasted_iota(jnp.int32, (TB, V), 1)
    onehot = (tok_ref[...] == iota_v).astype(jnp.float32)              # (T*B, V)
    gx_all = jnp.dot(onehot, embwx_ref[...],
                     preferred_element_type=jnp.float32)                # (T*B, 3*GP)
    gx_all = gx_all + bx_ref[...]                                       # bias once

    whh = whh_ref[...]                                                  # (H, 3*GP)
    bhn = jnp.broadcast_to(bhn_ref[...], (B, H))                        # hoisted bcast

    h = jnp.zeros((B, H), jnp.float32)
    hs = []
    for t in range(T):                                  # static unroll, T is small
        gx = gx_all[t * B:(t + 1) * B, :]               # (B, 3*GP) contiguous rows
        gh = jnp.dot(h, whh, preferred_element_type=jnp.float32)        # (B, 3*GP)

        r = jax.nn.sigmoid(gx[:, 0:H] + gh[:, 0:H])
        z = jax.nn.sigmoid(gx[:, GP:GP + H] + gh[:, GP:GP + H])
        n = jnp.tanh(gx[:, 2 * GP:2 * GP + H]
                     + r * (gh[:, 2 * GP:2 * GP + H] + bhn))
        h = (1.0 - z) * n + z * h
        hs.append(h)

    # Single lane-dense (B, T*H) store (unmasked vst) instead of T narrow stores.
    out_ref[...] = jnp.concatenate(hs, axis=1)


def gru_forward_pallas(tok, emb_wx, w_hh_cat, bx, bhn):
    """tok: (B, T) int32 -> outputs (B, T, H) float32 (batch_first)."""
    B, T = tok.shape
    H = bhn.shape[-1]
    # Time-major (T*B, 1) so each step's rows are a contiguous static slice.
    tok_tm = tok.astype(jnp.int32).T.reshape(T * B, 1)
    vmem = pl.BlockSpec(memory_space=pltpu.MemorySpace.VMEM)
    out2d = pl.pallas_call(
        gru_kernel,
        out_shape=jax.ShapeDtypeStruct((B, T * H), jnp.float32),
        in_specs=[vmem, vmem, vmem, vmem, vmem],
        out_specs=vmem,
    )(tok_tm, emb_wx, w_hh_cat, bx, bhn)
    return out2d.reshape(B, T, H)


# --------------------------- host-side parameter prep ------------------------
def prepare_params(params, gate_pitch=128):
    """Fold per-gate weights/biases into the kernel-friendly padded layout (once)."""
    w_ih = params["w_ih"]                       # (3, H, H), pre-transposed (x @ W_g)
    w_hh = params["w_hh"]                       # (3, H, H), pre-transposed (h @ U_g)
    b_ih = params["b_ih"].reshape(3, -1)        # (3, H)
    b_hh = params["b_hh"].reshape(3, -1)        # (3, H)
    H = w_ih.shape[-1]
    GP = max(gate_pitch, H)                     # each gate starts on a 128-lane boundary

    def pad_cols(m):                            # (R, H) -> (R, GP), zero padded
        return jnp.pad(m, ((0, 0), (0, GP - H)))

    w_ih_cat = jnp.concatenate([pad_cols(w_ih[g]) for g in range(3)], axis=1)  # (H,3GP)
    w_hh_cat = jnp.concatenate([pad_cols(w_hh[g]) for g in range(3)], axis=1)  # (H,3GP)

    # Exact fusion of embedding lookup + input projection:
    # row tok of (E @ W_ih_cat) == E[tok] @ W_ih_cat.
    emb_wx = params["embedding"].astype(jnp.float32) @ w_ih_cat                # (V,3GP)

    bx_gates = [b_ih[0] + b_hh[0], b_ih[1] + b_hh[1], b_ih[2]]
    bx = jnp.concatenate([pad_cols(g[None, :]) for g in bx_gates], axis=1)     # (1,3GP)
    bhn = b_hh[2][None, :]                                                     # (1, H)
    return {"emb_wx": emb_wx, "w_hh": w_hh_cat, "bx": bx, "bhn": bhn}


# ------------------------------ Encoder wrapper ------------------------------
def encoder_forward(input_src, prep):
    """input_src: (B, T) int32 -> (outputs (B, T, H), hidden (1, B, H))."""
    outputs = gru_forward_pallas(input_src, prep["emb_wx"], prep["w_hh"],
                                 prep["bx"], prep["bhn"])
    hidden = outputs[:, -1, :][None, :, :]      # (1, B, H): single layer, unidirectional
    return outputs, hidden


# --------------------------- pure-JAX reference GRU --------------------------
def encoder_reference(input_src, params):
    src_emb = jnp.take(params["embedding"], input_src, axis=0).astype(jnp.float32)
    w_ih, w_hh, b_ih, b_hh = (params["w_ih"], params["w_hh"],
                              params["b_ih"], params["b_hh"])

    def step(h, x_t):
        gx_r = x_t @ w_ih[0] + b_ih[0]
        gx_z = x_t @ w_ih[1] + b_ih[1]
        gx_n = x_t @ w_ih[2] + b_ih[2]
        gh_r = h @ w_hh[0] + b_hh[0]
        gh_z = h @ w_hh[1] + b_hh[1]
        gh_n = h @ w_hh[2] + b_hh[2]
        r = jax.nn.sigmoid(gx_r + gh_r)
        z = jax.nn.sigmoid(gx_z + gh_z)
        n = jnp.tanh(gx_n + r * gh_n)
        h_new = (1.0 - z) * n + z * h
        return h_new, h_new

    B, T, H = src_emb.shape
    h0 = jnp.zeros((B, H), jnp.float32)
    hT, outs = jax.lax.scan(step, h0, jnp.swapaxes(src_emb, 0, 1))
    return jnp.swapaxes(outs, 0, 1), hT[None]


# ---------------------------------- main --------------------------------------
if __name__ == "__main__":
    # Small shapes consistent with the module: vocab=50, hidden=32, B=2, T=8.
    VOCAB, HIDDEN, INIT_W = 50, 32, 0.1
    B, T = 2, 8

    key = jax.random.PRNGKey(0)
    k_emb, k_wih, k_whh, k_bih, k_bhh, k_tok = jax.random.split(key, 6)

    # Deterministic uniform(-init_weight, init_weight) init, like __initParameters.
    params = {
        "embedding": jax.random.uniform(k_emb, (VOCAB, HIDDEN), jnp.float32,
                                        -INIT_W, INIT_W),
        # stored pre-transposed per gate so the math is x @ W_g / h @ U_g
        "w_ih": jax.random.uniform(k_wih, (3, HIDDEN, HIDDEN), jnp.float32,
                                   -INIT_W, INIT_W),
        "w_hh": jax.random.uniform(k_whh, (3, HIDDEN, HIDDEN), jnp.float32,
                                   -INIT_W, INIT_W),
        "b_ih": jax.random.uniform(k_bih, (3, 1, HIDDEN), jnp.float32,
                                   -INIT_W, INIT_W),
        "b_hh": jax.random.uniform(k_bhh, (3, 1, HIDDEN), jnp.float32,
                                   -INIT_W, INIT_W),
    }

    input_src = jax.random.randint(k_tok, (B, T), 0, VOCAB, dtype=jnp.int32)

    prep = prepare_params(params)            # one-time host-side weight folding

    outputs, hidden = jax.jit(encoder_forward)(input_src, prep)
    outputs = jax.block_until_ready(outputs)
    hidden = jax.block_until_ready(hidden)

    ref_out, ref_hid = encoder_reference(input_src, params)

    assert outputs.shape == (B, T, HIDDEN)
    assert hidden.shape == (1, B, HIDDEN)
    assert jnp.allclose(outputs, ref_out, atol=1e-4, rtol=1e-4)
    assert jnp.allclose(hidden, ref_hid, atol=1e-4, rtol=1e-4)

    print("KERNEL_OK")
</pallas_src>

<mosaic_0001>
module attributes {stable_mosaic.version = 11 : i64} {
  func.func @gru_kernel(%arg0: memref<16x1xi32, #tpu.memory_space<vmem>>, %arg1: memref<50x384xf32, #tpu.memory_space<vmem>>, %arg2: memref<32x384xf32, #tpu.memory_space<vmem>>, %arg3: memref<1x384xf32, #tpu.memory_space<vmem>>, %arg4: memref<1x32xf32, #tpu.memory_space<vmem>>, %arg5: memref<2x256xf32, #tpu.memory_space<vmem>>) attributes {dimension_semantics = [], scalar_prefetch = 0 : i64, scratch_operands = 0 : i64, tpu.core_type = #tpu.core_type<tc>} {
    %0 = tpu.iota {dimensions = array<i32: 1>} : vector<16x50xi32>
    %c0 = arith.constant 0 : index
    %c0_0 = arith.constant 0 : index
    %1 = vector.load %arg0[%c0, %c0_0] : memref<16x1xi32, #tpu.memory_space<vmem>>, vector<16x1xi32>
    %2 = vector.broadcast %1 : vector<16x1xi32> to vector<16x50xi32>
    %3 = arith.cmpi eq, %2, %0 : vector<16x50xi32>
    %4 = arith.extui %3 : vector<16x50xi1> to vector<16x50xi32>
    %5 = arith.sitofp %4 : vector<16x50xi32> to vector<16x50xf32>
    %c0_1 = arith.constant 0 : index
    %c0_2 = arith.constant 0 : index
    %6 = vector.load %arg1[%c0_1, %c0_2] : memref<50x384xf32, #tpu.memory_space<vmem>>, vector<50x384xf32>
    %cst = arith.constant dense<0.000000e+00> : vector<16x384xf32>
    %7 = tpu.matmul %5, %6, %cst {dimension_numbers = #tpu.dot_dimension_numbers<[1], [0], [0], [1], [0, 0, 1, 1], [], []>} : vector<16x50xf32>, vector<50x384xf32>, vector<16x384xf32> -> vector<16x384xf32>
    %c0_3 = arith.constant 0 : index
    %c0_4 = arith.constant 0 : index
    %8 = vector.load %arg3[%c0_3, %c0_4] : memref<1x384xf32, #tpu.memory_space<vmem>>, vector<1x384xf32>
    %9 = vector.broadcast %8 : vector<1x384xf32> to vector<16x384xf32>
    %10 = arith.addf %7, %9 : vector<16x384xf32>
    %c0_5 = arith.constant 0 : index
    %c0_6 = arith.constant 0 : index
    %11 = vector.load %arg2[%c0_5, %c0_6] : memref<32x384xf32, #tpu.memory_space<vmem>>, vector<32x384xf32>
    %c0_7 = arith.constant 0 : index
    %c0_8 = arith.constant 0 : index
    %12 = vector.load %arg4[%c0_7, %c0_8] : memref<1x32xf32, #tpu.memory_space<vmem>>, vector<1x32xf32>
    %13 = vector.shape_cast %12 : vector<1x32xf32> to vector<1x32xf32>
    %14 = vector.broadcast %13 : vector<1x32xf32> to vector<2x32xf32>
    %cst_9 = arith.constant 0.000000e+00 : f32
    %15 = vector.broadcast %cst_9 : f32 to vector<2x32xf32>
    %16 = vector.extract_strided_slice %10 {offsets = [0, 0], sizes = [2, 384], strides = [1, 1]} : vector<16x384xf32> to vector<2x384xf32>
    %cst_10 = arith.constant dense<0.000000e+00> : vector<2x384xf32>
    %17 = tpu.matmul %15, %11, %cst_10 {dimension_numbers = #tpu.dot_dimension_numbers<[1], [0], [0], [1], [0, 0, 1, 1], [], []>} : vector<2x32xf32>, vector<32x384xf32>, vector<2x384xf32> -> vector<2x384xf32>
    %18 = vector.extract_strided_slice %16 {offsets = [0, 0], sizes = [2, 32], strides = [1, 1]} : vector<2x384xf32> to vector<2x32xf32>
    %19 = vector.extract_strided_slice %17 {offsets = [0, 0], sizes = [2, 32], strides = [1, 1]} : vector<2x384xf32> to vector<2x32xf32>
    %20 = arith.addf %18, %19 : vector<2x32xf32>
    %21 = arith.negf %20 : vector<2x32xf32>
    %22 = math.exp %21 : vector<2x32xf32>
    %cst_11 = arith.constant 1.000000e+00 : f32
    %23 = vector.broadcast %cst_11 : f32 to vector<2x32xf32>
    %24 = arith.addf %23, %22 : vector<2x32xf32>
    %25 = arith.divf %23, %24 : vector<2x32xf32>
    %26 = vector.extract_strided_slice %16 {offsets = [0, 128], sizes = [2, 32], strides = [1, 1]} : vector<2x384xf32> to vector<2x32xf32>
    %27 = vector.extract_strided_slice %17 {offsets = [0, 128], sizes = [2, 32], strides = [1, 1]} : vector<2x384xf32> to vector<2x32xf32>
    %28 = arith.addf %26, %27 : vector<2x32xf32>
    %29 = arith.negf %28 : vector<2x32xf32>
    %30 = math.exp %29 : vector<2x32xf32>
    %cst_12 = arith.constant 1.000000e+00 : f32
    %31 = vector.broadcast %cst_12 : f32 to vector<2x32xf32>
    %32 = arith.addf %31, %30 : vector<2x32xf32>
    %33 = arith.divf %31, %32 : vector<2x32xf32>
    %34 = vector.extract_strided_slice %16 {offsets = [0, 256], sizes = [2, 32], strides = [1, 1]} : vector<2x384xf32> to vector<2x32xf32>
    %35 = vector.extract_strided_slice %17 {offsets = [0, 256], sizes = [2, 32], strides = [1, 1]} : vector<2x384xf32> to vector<2x32xf32>
    %36 = arith.addf %35, %14 : vector<2x32xf32>
    %37 = arith.mulf %25, %36 : vector<2x32xf32>
    %38 = arith.addf %34, %37 : vector<2x32xf32>
    %39 = math.tanh %38 : vector<2x32xf32>
    %cst_13 = arith.constant 1.000000e+00 : f32
    %40 = vector.broadcast %cst_13 : f32 to vector<2x32xf32>
    %41 = arith.subf %40, %33 : vector<2x32xf32>
    %42 = arith.mulf %41, %39 : vector<2x32xf32>
    %43 = arith.mulf %33, %15 : vector<2x32xf32>
    %44 = arith.addf %42, %43 : vector<2x32xf32>
    %45 = vector.extract_strided_slice %10 {offsets = [2, 0], sizes = [2, 384], strides = [1, 1]} : vector<16x384xf32> to vector<2x384xf32>
    %cst_14 = arith.constant dense<0.000000e+00> : vector<2x384xf32>
    %46 = tpu.matmul %44, %11, %cst_14 {dimension_numbers = #tpu.dot_dimension_numbers<[1], [0], [0], [1], [0, 0, 1, 1], [], []>} : vector<2x32xf32>, vector<32x384xf32>, vector<2x384xf32> -> vector<2x384xf32>
    %47 = vector.extract_strided_slice %45 {offsets = [0, 0], sizes = [2, 32], strides = [1, 1]} : vector<2x384xf32> to vector<2x32xf32>
    %48 = vector.extract_strided_slice %46 {offsets = [0, 0], sizes = [2, 32], strides = [1, 1]} : vector<2x384xf32> to vector<2x32xf32>
    %49 = arith.addf %47, %48 : vector<2x32xf32>
    %50 = arith.negf %49 : vector<2x32xf32>
    %51 = math.exp %50 : vector<2x32xf32>
    %cst_15 = arith.constant 1.000000e+00 : f32
    %52 = vector.broadcast %cst_15 : f32 to vector<2x32xf32>
    %53 = arith.addf %52, %51 : vector<2x32xf32>
    %54 = arith.divf %52, %53 : vector<2x32xf32>
    %55 = vector.extract_strided_slice %45 {offsets = [0, 128], sizes = [2, 32], strides = [1, 1]} : vector<2x384xf32> to vector<2x32xf32>
    %56 = vector.extract_strided_slice %46 {offsets = [0, 128], sizes = [2, 32], strides = [1, 1]} : vector<2x384xf32> to vector<2x32xf32>
    %57 = arith.addf %55, %56 : vector<2x32xf32>
    %58 = arith.negf %57 : vector<2x32xf32>
    %59 = math.exp %58 : vector<2x32xf32>
    %cst_16 = arith.constant 1.000000e+00 : f32
    %60 = vector.broadcast %cst_16 : f32 to vector<2x32xf32>
    %61 = arith.addf %60, %59 : vector<2x32xf32>
    %62 = arith.divf %60, %61 : vector<2x32xf32>
    %63 = vector.extract_strided_slice %45 {offsets = [0, 256], sizes = [2, 32], strides = [1, 1]} : vector<2x384xf32> to vector<2x32xf32>
    %64 = vector.extract_strided_slice %46 {offsets = [0, 256], sizes = [2, 32], strides = [1, 1]} : vector<2x384xf32> to vector<2x32xf32>
    %65 = arith.addf %64, %14 : vector<2x32xf32>
    %66 = arith.mulf %54, %65 : vector<2x32xf32>
    %67 = arith.addf %63, %66 : vector<2x32xf32>
    %68 = math.tanh %67 : vector<2x32xf32>
    %cst_17 = arith.constant 1.000000e+00 : f32
    %69 = vector.broadcast %cst_17 : f32 to vector<2x32xf32>
    %70 = arith.subf %69, %62 : vector<2x32xf32>
    %71 = arith.mulf %70, %68 : vector<2x32xf32>
    %72 = arith.mulf %62, %44 : vector<2x32xf32>
    %73 = arith.addf %71, %72 : vector<2x32xf32>
    %74 = vector.extract_strided_slice %10 {offsets = [4, 0], sizes = [2, 384], strides = [1, 1]} : vector<16x384xf32> to vector<2x384xf32>
    %cst_18 = arith.constant dense<0.000000e+00> : vector<2x384xf32>
    %75 = tpu.matmul %73, %11, %cst_18 {dimension_numbers = #tpu.dot_dimension_numbers<[1], [0], [0], [1], [0, 0, 1, 1], [], []>} : vector<2x32xf32>, vector<32x384xf32>, vector<2x384xf32> -> vector<2x384xf32>
    %76 = vector.extract_strided_slice %74 {offsets = [0, 0], sizes = [2, 32], strides = [1, 1]} : vector<2x384xf32> to vector<2x32xf32>
    %77 = vector.extract_strided_slice %75 {offsets = [0, 0], sizes = [2, 32], strides = [1, 1]} : vector<2x384xf32> to vector<2x32xf32>
    %78 = arith.addf %76, %77 : vector<2x32xf32>
    %79 = arith.negf %78 : vector<2x32xf32>
    %80 = math.exp %79 : vector<2x32xf32>
    %cst_19 = arith.constant 1.000000e+00 : f32
    %81 = vector.broadcast %cst_19 : f32 to vector<2x32xf32>
    %82 = arith.addf %81, %80 : vector<2x32xf32>
    %83 = arith.divf %81, %82 : vector<2x32xf32>
    %84 = vector.extract_strided_slice %74 {offsets = [0, 128], sizes = [2, 32], strides = [1, 1]} : vector<2x384xf32> to vector<2x32xf32>
    %85 = vector.extract_strided_slice %75 {offsets = [0, 128], sizes = [2, 32], strides = [1, 1]} : vector<2x384xf32> to vector<2x32xf32>
    %86 = arith.addf %84, %85 : vector<2x32xf32>
    %87 = arith.negf %86 : vector<2x32xf32>
    %88 = math.exp %87 : vector<2x32xf32>
    %cst_20 = arith.constant 1.000000e+00 : f32
    %89 = vector.broadcast %cst_20 : f32 to vector<2x32xf32>
    %90 = arith.addf %89, %88 : vector<2x32xf32>
    %91 = arith.divf %89, %90 : vector<2x32xf32>
    %92 = vector.extract_strided_slice %74 {offsets = [0, 256], sizes = [2, 32], strides = [1, 1]} : vector<2x384xf32> to vector<2x32xf32>
    %93 = vector.extract_strided_slice %75 {offsets = [0, 256], sizes = [2, 32], strides = [1, 1]} : vector<2x384xf32> to vector<2x32xf32>
    %94 = arith.addf %93, %14 : vector<2x32xf32>
    %95 = arith.mulf %83, %94 : vector<2x32xf32>
    %96 = arith.addf %92, %95 : vector<2x32xf32>
    %97 = math.tanh %96 : vector<2x32xf32>
    %cst_21 = arith.constant 1.000000e+00 : f32
    %98 = vector.broadcast %cst_21 : f32 to vector<2x32xf32>
    %99 = arith.subf %98, %91 : vector<2x32xf32>
    %100 = arith.mulf %99, %97 : vector<2x32xf32>
    %101 = arith.mulf %91, %73 : vector<2x32xf32>
    %102 = arith.addf %100, %101 : vector<2x32xf32>
    %103 = vector.extract_strided_slice %10 {offsets = [6, 0], sizes = [2, 384], strides = [1, 1]} : vector<16x384xf32> to vector<2x384xf32>
    %cst_22 = arith.constant dense<0.000000e+00> : vector<2x384xf32>
    %104 = tpu.matmul %102, %11, %cst_22 {dimension_numbers = #tpu.dot_dimension_numbers<[1], [0], [0], [1], [0, 0, 1, 1], [], []>} : vector<2x32xf32>, vector<32x384xf32>, vector<2x384xf32> -> vector<2x384xf32>
    %105 = vector.extract_strided_slice %103 {offsets = [0, 0], sizes = [2, 32], strides = [1, 1]} : vector<2x384xf32> to vector<2x32xf32>
    %106 = vector.extract_strided_slice %104 {offsets = [0, 0], sizes = [2, 32], strides = [1, 1]} : vector<2x384xf32> to vector<2x32xf32>
    %107 = arith.addf %105, %106 : vector<2x32xf32>
    %108 = arith.negf %107 : vector<2x32xf32>
    %109 = math.exp %108 : vector<2x32xf32>
    %cst_23 = arith.constant 1.000000e+00 : f32
    %110 = vector.broadcast %cst_23 : f32 to vector<2x32xf32>
    %111 = arith.addf %110, %109 : vector<2x32xf32>
    %112 = arith.divf %110, %111 : vector<2x32xf32>
    %113 = vector.extract_strided_slice %103 {offsets = [0, 128], sizes = [2, 32], strides = [1, 1]} : vector<2x384xf32> to vector<2x32xf32>
    %114 = vector.extract_strided_slice %104 {offsets = [0, 128], sizes = [2, 32], strides = [1, 1]} : vector<2x384xf32> to vector<2x32xf32>
    %115 = arith.addf %113, %114 : vector<2x32xf32>
    %116 = arith.negf %115 : vector<2x32xf32>
    %117 = math.exp %116 : vector<2x32xf32>
    %cst_24 = arith.constant 1.000000e+00 : f32
    %118 = vector.broadcast %cst_24 : f32 to vector<2x32xf32>
    %119 = arith.addf %118, %117 : vector<2x32xf32>
    %120 = arith.divf %118, %119 : vector<2x32xf32>
    %121 = vector.extract_strided_slice %103 {offsets = [0, 256], sizes = [2, 32], strides = [1, 1]} : vector<2x384xf32> to vector<2x32xf32>
    %122 = vector.extract_strided_slice %104 {offsets = [0, 256], sizes = [2, 32], strides = [1, 1]} : vector<2x384xf32> to vector<2x32xf32>
    %123 = arith.addf %122, %14 : vector<2x32xf32>
    %124 = arith.mulf %112, %123 : vector<2x32xf32>
    %125 = arith.addf %121, %124 : vector<2x32xf32>
    %126 = math.tanh %125 : vector<2x32xf32>
    %cst_25 = arith.constant 1.000000e+00 : f32
    %127 = vector.broadcast %cst_25 : f32 to vector<2x32xf32>
    %128 = arith.subf %127, %120 : vector<2x32xf32>
    %129 = arith.mulf %128, %126 : vector<2x32xf32>
    %130 = arith.mulf %120, %102 : vector<2x32xf32>
    %131 = arith.addf %129, %130 : vector<2x32xf32>
    %132 = vector.extract_strided_slice %10 {offsets = [8, 0], sizes = [2, 384], strides = [1, 1]} : vector<16x384xf32> to vector<2x384xf32>
    %cst_26 = arith.constant dense<0.000000e+00> : vector<2x384xf32>
    %133 = tpu.matmul %131, %11, %cst_26 {dimension_numbers = #tpu.dot_dimension_numbers<[1], [0], [0], [1], [0, 0, 1, 1], [], []>} : vector<2x32xf32>, vector<32x384xf32>, vector<2x384xf32> -> vector<2x384xf32>
    %134 = vector.extract_strided_slice %132 {offsets = [0, 0], sizes = [2, 32], strides = [1, 1]} : vector<2x384xf32> to vector<2x32xf32>
    %135 = vector.extract_strided_slice %133 {offsets = [0, 0], sizes = [2, 32], strides = [1, 1]} : vector<2x384xf32> to vector<2x32xf32>
    %136 = arith.addf %134, %135 : vector<2x32xf32>
    %137 = arith.negf %136 : vector<2x32xf32>
    %138 = math.exp %137 : vector<2x32xf32>
    %cst_27 = arith.constant 1.000000e+00 : f32
    %139 = vector.broadcast %cst_27 : f32 to vector<2x32xf32>
    %140 = arith.addf %139, %138 : vector<2x32xf32>
    %141 = arith.divf %139, %140 : vector<2x32xf32>
    %142 = vector.extract_strided_slice %132 {offsets = [0, 128], sizes = [2, 32], strides = [1, 1]} : vector<2x384xf32> to vector<2x32xf32>
    %143 = vector.extract_strided_slice %133 {offsets = [0, 128], sizes = [2, 32], strides = [1, 1]} : vector<2x384xf32> to vector<2x32xf32>
    %144 = arith.addf %142, %143 : vector<2x32xf32>
    %145 = arith.negf %144 : vector<2x32xf32>
    %146 = math.exp %145 : vector<2x32xf32>
    %cst_28 = arith.constant 1.000000e+00 : f32
    %147 = vector.broadcast %cst_28 : f32 to vector<2x32xf32>
    %148 = arith.addf %147, %146 : vector<2x32xf32>
    %149 = arith.divf %147, %148 : vector<2x32xf32>
    %150 = vector.extract_strided_slice %132 {offsets = [0, 256], sizes = [2, 32], strides = [1, 1]} : vector<2x384xf32> to vector<2x32xf32>
    %151 = vector.extract_strided_slice %133 {offsets = [0, 256], sizes = [2, 32], strides = [1, 1]} : vector<2x384xf32> to vector<2x32xf32>
    %152 = arith.addf %151, %14 : vector<2x32xf32>
    %153 = arith.mulf %141, %152 : vector<2x32xf32>
    %154 = arith.addf %150, %153 : vector<2x32xf32>
    %155 = math.tanh %154 : vector<2x32xf32>
    %cst_29 = arith.constant 1.000000e+00 : f32
    %156 = vector.broadcast %cst_29 : f32 to vector<2x32xf32>
    %157 = arith.subf %156, %149 : vector<2x32xf32>
    %158 = arith.mulf %157, %155 : vector<2x32xf32>
    %159 = arith.mulf %149, %131 : vector<2x32xf32>
    %160 = arith.addf %158, %159 : vector<2x32xf32>
    %161 = vector.extract_strided_slice %10 {offsets = [10, 0], sizes = [2, 384], strides = [1, 1]} : vector<16x384xf32> to vector<2x384xf32>
    %cst_30 = arith.constant dense<0.000000e+00> : vector<2x384xf32>
    %162 = tpu.matmul %160, %11, %cst_30 {dimension_numbers = #tpu.dot_dimension_numbers<[1], [0], [0], [1], [0, 0, 1, 1], [], []>} : vector<2x32xf32>, vector<32x384xf32>, vector<2x384xf32> -> vector<2x384xf32>
    %163 = vector.extract_strided_slice %161 {offsets = [0, 0], sizes = [2, 32], strides = [1, 1]} : vector<2x384xf32> to vector<2x32xf32>
    %164 = vector.extract_strided_slice %162 {offsets = [0, 0], sizes = [2, 32], strides = [1, 1]} : vector<2x384xf32> to vector<2x32xf32>
    %165 = arith.addf %163, %164 : vector<2x32xf32>
    %166 = arith.negf %165 : vector<2x32xf32>
    %167 = math.exp %166 : vector<2x32xf32>
    %cst_31 = arith.constant 1.000000e+00 : f32
    %168 = vector.broadcast %cst_31 : f32 to vector<2x32xf32>
    %169 = arith.addf %168, %167 : vector<2x32xf32>
    %170 = arith.divf %168, %169 : vector<2x32xf32>
    %171 = vector.extract_strided_slice %161 {offsets = [0, 128], sizes = [2, 32], strides = [1, 1]} : vector<2x384xf32> to vector<2x32xf32>
    %172 = vector.extract_strided_slice %162 {offsets = [0, 128], sizes = [2, 32], strides = [1, 1]} : vector<2x384xf32> to vector<2x32xf32>
    %173 = arith.addf %171, %172 : vector<2x32xf32>
    %174 = arith.negf %173 : vector<2x32xf32>
    %175 = math.exp %174 : vector<2x32xf32>
    %cst_32 = arith.constant 1.000000e+00 : f32
    %176 = vector.broadcast %cst_32 : f32 to vector<2x32xf32>
    %177 = arith.addf %176, %175 : vector<2x32xf32>
    %178 = arith.divf %176, %177 : vector<2x32xf32>
    %179 = vector.extract_strided_slice %161 {offsets = [0, 256], sizes = [2, 32], strides = [1, 1]} : vector<2x384xf32> to vector<2x32xf32>
    %180 = vector.extract_strided_slice %162 {offsets = [0, 256], sizes = [2, 32], strides = [1, 1]} : vector<2x384xf32> to vector<2x32xf32>
    %181 = arith.addf %180, %14 : vector<2x32xf32>
    %182 = arith.mulf %170, %181 : vector<2x32xf32>
    %183 = arith.addf %179, %182 : vector<2x32xf32>
    %184 = math.tanh %183 : vector<2x32xf32>
    %cst_33 = arith.constant 1.000000e+00 : f32
    %185 = vector.broadcast %cst_33 : f32 to vector<2x32xf32>
    %186 = arith.subf %185, %178 : vector<2x32xf32>
    %187 = arith.mulf %186, %184 : vector<2x32xf32>
    %188 = arith.mulf %178, %160 : vector<2x32xf32>
    %189 = arith.addf %187, %188 : vector<2x32xf32>
    %190 = vector.extract_strided_slice %10 {offsets = [12, 0], sizes = [2, 384], strides = [1, 1]} : vector<16x384xf32> to vector<2x384xf32>
    %cst_34 = arith.constant dense<0.000000e+00> : vector<2x384xf32>
    %191 = tpu.matmul %189, %11, %cst_34 {dimension_numbers = #tpu.dot_dimension_numbers<[1], [0], [0], [1], [0, 0, 1, 1], [], []>} : vector<2x32xf32>, vector<32x384xf32>, vector<2x384xf32> -> vector<2x384xf32>
    %192 = vector.extract_strided_slice %190 {offsets = [0, 0], sizes = [2, 32], strides = [1, 1]} : vector<2x384xf32> to vector<2x32xf32>
    %193 = vector.extract_strided_slice %191 {offsets = [0, 0], sizes = [2, 32], strides = [1, 1]} : vector<2x384xf32> to vector<2x32xf32>
    %194 = arith.addf %192, %193 : vector<2x32xf32>
    %195 = arith.negf %194 : vector<2x32xf32>
    %196 = math.exp %195 : vector<2x32xf32>
    %cst_35 = arith.constant 1.000000e+00 : f32
    %197 = vector.broadcast %cst_35 : f32 to vector<2x32xf32>
    %198 = arith.addf %197, %196 : vector<2x32xf32>
    %199 = arith.divf %197, %198 : vector<2x32xf32>
    %200 = vector.extract_strided_slice %190 {offsets = [0, 128], sizes = [2, 32], strides = [1, 1]} : vector<2x384xf32> to vector<2x32xf32>
    %201 = vector.extract_strided_slice %191 {offsets = [0, 128], sizes = [2, 32], strides = [1, 1]} : vector<2x384xf32> to vector<2x32xf32>
    %202 = arith.addf %200, %201 : vector<2x32xf32>
    %203 = arith.negf %202 : vector<2x32xf32>
    %204 = math.exp %203 : vector<2x32xf32>
    %cst_36 = arith.constant 1.000000e+00 : f32
    %205 = vector.broadcast %cst_36 : f32 to vector<2x32xf32>
    %206 = arith.addf %205, %204 : vector<2x32xf32>
    %207 = arith.divf %205, %206 : vector<2x32xf32>
    %208 = vector.extract_strided_slice %190 {offsets = [0, 256], sizes = [2, 32], strides = [1, 1]} : vector<2x384xf32> to vector<2x32xf32>
    %209 = vector.extract_strided_slice %191 {offsets = [0, 256], sizes = [2, 32], strides = [1, 1]} : vector<2x384xf32> to vector<2x32xf32>
    %210 = arith.addf %209, %14 : vector<2x32xf32>
    %211 = arith.mulf %199, %210 : vector<2x32xf32>
    %212 = arith.addf %208, %211 : vector<2x32xf32>
    %213 = math.tanh %212 : vector<2x32xf32>
    %cst_37 = arith.constant 1.000000e+00 : f32
    %214 = vector.broadcast %cst_37 : f32 to vector<2x32xf32>
    %215 = arith.subf %214, %207 : vector<2x32xf32>
    %216 = arith.mulf %215, %213 : vector<2x32xf32>
    %217 = arith.mulf %207, %189 : vector<2x32xf32>
    %218 = arith.addf %216, %217 : vector<2x32xf32>
    %219 = vector.extract_strided_slice %10 {offsets = [14, 0], sizes = [2, 384], strides = [1, 1]} : vector<16x384xf32> to vector<2x384xf32>
    %cst_38 = arith.constant dense<0.000000e+00> : vector<2x384xf32>
    %220 = tpu.matmul %218, %11, %cst_38 {dimension_numbers = #tpu.dot_dimension_numbers<[1], [0], [0], [1], [0, 0, 1, 1], [], []>} : vector<2x32xf32>, vector<32x384xf32>, vector<2x384xf32> -> vector<2x384xf32>
    %221 = vector.extract_strided_slice %219 {offsets = [0, 0], sizes = [2, 32], strides = [1, 1]} : vector<2x384xf32> to vector<2x32xf32>
    %222 = vector.extract_strided_slice %220 {offsets = [0, 0], sizes = [2, 32], strides = [1, 1]} : vector<2x384xf32> to vector<2x32xf32>
    %223 = arith.addf %221, %222 : vector<2x32xf32>
    %224 = arith.negf %223 : vector<2x32xf32>
    %225 = math.exp %224 : vector<2x32xf32>
    %cst_39 = arith.constant 1.000000e+00 : f32
    %226 = vector.broadcast %cst_39 : f32 to vector<2x32xf32>
    %227 = arith.addf %226, %225 : vector<2x32xf32>
    %228 = arith.divf %226, %227 : vector<2x32xf32>
    %229 = vector.extract_strided_slice %219 {offsets = [0, 128], sizes = [2, 32], strides = [1, 1]} : vector<2x384xf32> to vector<2x32xf32>
    %230 = vector.extract_strided_slice %220 {offsets = [0, 128], sizes = [2, 32], strides = [1, 1]} : vector<2x384xf32> to vector<2x32xf32>
    %231 = arith.addf %229, %230 : vector<2x32xf32>
    %232 = arith.negf %231 : vector<2x32xf32>
    %233 = math.exp %232 : vector<2x32xf32>
    %cst_40 = arith.constant 1.000000e+00 : f32
    %234 = vector.broadcast %cst_40 : f32 to vector<2x32xf32>
    %235 = arith.addf %234, %233 : vector<2x32xf32>
    %236 = arith.divf %234, %235 : vector<2x32xf32>
    %237 = vector.extract_strided_slice %219 {offsets = [0, 256], sizes = [2, 32], strides = [1, 1]} : vector<2x384xf32> to vector<2x32xf32>
    %238 = vector.extract_strided_slice %220 {offsets = [0, 256], sizes = [2, 32], strides = [1, 1]} : vector<2x384xf32> to vector<2x32xf32>
    %239 = arith.addf %238, %14 : vector<2x32xf32>
    %240 = arith.mulf %228, %239 : vector<2x32xf32>
    %241 = arith.addf %237, %240 : vector<2x32xf32>
    %242 = math.tanh %241 : vector<2x32xf32>
    %cst_41 = arith.constant 1.000000e+00 : f32
    %243 = vector.broadcast %cst_41 : f32 to vector<2x32xf32>
    %244 = arith.subf %243, %236 : vector<2x32xf32>
    %245 = arith.mulf %244, %242 : vector<2x32xf32>
    %246 = arith.mulf %236, %218 : vector<2x32xf32>
    %247 = arith.addf %245, %246 : vector<2x32xf32>
    %248 = tpu.concatenate %44, %73, %102, %131, %160, %189, %218, %247 in 1 : vector<2x32xf32>, vector<2x32xf32>, vector<2x32xf32>, vector<2x32xf32>, vector<2x32xf32>, vector<2x32xf32>, vector<2x32xf32>, vector<2x32xf32> -> vector<2x256xf32>
    %c0_42 = arith.constant 0 : index
    %c0_43 = arith.constant 0 : index
    %249 = vector.load %arg5[%c0_42, %c0_43] : memref<2x256xf32, #tpu.memory_space<vmem>>, vector<2x256xf32>
    tpu.vector_store %arg5[%c0_42, %c0_43], %248 {strides = array<i32>} : memref<2x256xf32, #tpu.memory_space<vmem>>, vector<2x256xf32>,
    return
  }
}

</mosaic_0001>

<bundles_post_ra>
// kernel: encoder_forward.1
= control target key start
LH: loop header
LB: loop body
LE: loop exit
PB: predicated region body
PF: predicated region fallthrough
CT: control target
= control target key end

     0   :  { %10 = vsyncpa [#allocation3], 0  ;;  %s1720_s0 = inlined_call_operand.vmem [shape: s32[16,1], index: 0, kind: input, shape index: {}]   ;;  %s1721_s1 = inlined_call_operand.hbm [shape: f32[50,384], index: 1, kind: input, shape index: {}]   ;;  %s1722_s2 = inlined_call_operand.hbm [shape: f32[32,384], index: 2, kind: input, shape index: {}]   ;;  %s1723_s3 = inlined_call_operand.vmem [shape: f32[1,384], index: 3, kind: input, shape index: {}]   ;;  %s1724_s4 = inlined_call_operand.vmem [shape: f32[1,32], index: 4, kind: input, shape index: {}]   ;;  %s1725_s5 = inlined_call_operand.vmem [shape: f32[2,256], index: 5, kind: output, shape index: {}]  }
   0x1   :  { %s18_s20 = sshll.u32 %s1721_s1, 4  ;;  %s19_s20 = int_to_ptr.hbm [resolvable:$true] %s18_s20 }
   0x2   :  { %11 = vsyncpa [#allocation5], 0  ;;  %s1391_s21 = smov [#allocation2]   ;;  %s31_s25 = sshll.u32 %s1722_s2, 4  ;;  %s32_s25 = int_to_ptr.hbm [resolvable:$true] %s31_s25 }
   0x3   :  { %s20_s22 = sshll.u32 %s1391_s21, 4  ;;  %s1392_s26 = smov 384   ;;  %s21_s22 = int_to_ptr.vmem [resolvable:$true] %s20_s22 }
   0x4   :  { %s1393_s27 = smov 24   ;;  %s1394_s28 = smov [#allocation4]  }
   0x5   :  { %26 = dma.hbm_to_vmem [thread:$0]  %s19_s20, 2688, %s21_s22, [#allocation3], %s1392_s26, %s1392_s26, %s1393_s27  }
   0x6   :  { %s33_s29 = sshll.u32 %s1394_s28, 4  ;;  %s34_s29 = int_to_ptr.vmem [resolvable:$true] %s33_s29 }
   0x7   :  { %39 = dma.hbm_to_vmem [thread:$0]  %s32_s25, 1536, %s34_s29, [#allocation5], %s1392_s26, %s1392_s26, %s1393_s27  }
   0x8   :  { %1387 = dma.done.wait [#allocation3], 2688  }
   0x9   :  { %1388 = vsyncadd [#allocation3], 4294964608 }
   0xa   :  { %1389 = dma.done.wait [#allocation5], 1536  }
   0xb   :  { %1390 = vsyncadd [#allocation5], 4294965760  ;;  %v1395_v0 = vmov 0   ;;  %vm104_vm0 = vcmask 1041408   ;;  %v54_v1 = vld [vmem:[%s1720_s0] sm:$0xff]  ;;  %v1439_v2 = vld [vmem:[#allocation4 + $0x48] sm:$0xff]  ;;  %v52_v37 = vlaneseq }
   0xc   :  { %1257 = vset.pattern.permute.xlu0 %v1395_v0  ;;  %215 = vmatpush.msra.mxu3 %v1439_v2  ;;  %v1442_v3 = vld [vmem:[#allocation4 + $0x30] sm:$0xff]  ;;  %v86_v4 = vld [vmem:[#allocation2 + $0x90] sm:$0x3]  ;;  %v1444_v5 = vld [vmem:[#allocation4 + $0x18] sm:$0xff]  ;;  %v1396_v19 = vmov 0.0   ;;  %vm97_vm1 = vcmask 408576  }
   0xd   :  { %57 = vperm.xlu0 %1257, %v54_v1   ;;  %1202 = vmatpush.msk.msra.mxu0 %vm104_vm0, %v86_v4  ;;  %v87_v6 = vld [vmem:[#allocation2 + $0x98] sm:$0x3]  ;;  %v88_v7 = vld [vmem:[#allocation2 + $0xa0] sm:$0x3]  ;;  %v85_v10 = vld [vmem:[#allocation2 + $0x88] sm:$0xff]  ;;  %v53_v38 = vand.u32 127, %v52_v37 }
   0xe   :  { %216 = vmatpush.msra.mxu3 %v1442_v3  ;;  %1205 = vmatpush.msk.msra.mxu1 %vm104_vm0, %v87_v6  ;;  %v83_v8 = vld [vmem:[#allocation2 + $0x78] sm:$0xff]  ;;  %v84_v9 = vld [vmem:[#allocation2 + $0x80] sm:$0xff]  ;;  %v1450_v11 = vld [vmem:[#allocation4] sm:$0xff]  ;;  %vm199_vm12 = vcmask 261120   ;;  %s1398_s9 = smov 64   ;;  %s1399_s10 = smov 96  }
   0xf   :  { %1208 = vmatpush.msk.msra.mxu2 %vm104_vm0, %v88_v7  ;;  %124 = vmatpush.msra.mxu0 %v83_v8  ;;  %v80_v12 = vld [vmem:[#allocation2 + $0x60] sm:$0xff]  ;;  %v81_v13 = vld [vmem:[#allocation2 + $0x68] sm:$0xff]  ;;  %v82_v14 = vld [vmem:[#allocation2 + $0x70] sm:$0xff] }
  0x10   :  { %217 = vmatpush.msra.mxu3 %v1444_v5  ;;  %147 = vmatpush.msra.mxu1 %v84_v9  ;;  %v55_v15 = vld [vmem:[%s1720_s0 + $0x8] sm:$0xff]  ;;  %v1456_v16 = vld [vmem:[#allocation4 + $0x50] sm:$0xff]  ;;  %v78_v18 = vld [vmem:[#allocation2 + $0x50] sm:$0xff] }
  0x11   :  { %170 = vmatpush.msra.mxu2 %v85_v10  ;;  %125 = vmatpush.msra.mxu0 %v80_v12  ;;  %v77_v17 = vld [vmem:[#allocation2 + $0x48] sm:$0xff]  ;;  %v1460_v20 = vld [vmem:[#allocation4 + $0x38] sm:$0xff]  ;;  %v79_v21 = vld [vmem:[#allocation2 + $0x58] sm:$0xff] }
  0x12   :  { %218 = vmatpush.msra.mxu3 %v1450_v11  ;;  %148 = vmatpush.msra.mxu1 %v81_v13  ;;  %v74_v22 = vld [vmem:[#allocation2 + $0x30] sm:$0xff]  ;;  %v75_v23 = vld [vmem:[#allocation2 + $0x38] sm:$0xff]  ;;  %v1463_v24 = vld [vmem:[#allocation4 + $0x20] sm:$0xff] }
  0x13   :  { %219 = vmatmul.f32.vlgmr.msra.gmra.mxu3 %v1396_v19  ;;  %171 = vmatpush.msra.mxu2 %v82_v14  ;;  %v76_v25 = vld [vmem:[#allocation2 + $0x40] sm:$0xff]  ;;  %v71_v26 = vld [vmem:[#allocation2 + $0x18] sm:$0xff]  ;;  %v1466_v28 = vld [vmem:[#allocation4 + $0x8] sm:$0xff] }
  0x14   :  { %235 = vmatpush.msrb.mxu3 %v1456_v16  ;;  %126 = vmatpush.msra.mxu0 %v77_v17  ;;  %v72_v27 = vld [vmem:[#allocation2 + $0x20] sm:$0xff]  ;;  %v73_v29 = vld [vmem:[#allocation2 + $0x28] sm:$0xff]  ;;  %v70_v32 = vld [vmem:[#allocation2 + $0x10] sm:$0xff] }
  0x15   :  { %60 = vperm.xlu0 %1257, %v55_v15   ;;  %149 = vmatpush.msra.mxu1 %v78_v18  ;;  %v68_v30 = vld [vmem:[#allocation2] sm:$0xff]  ;;  %v69_v31 = vld [vmem:[#allocation2 + $0x8] sm:$0xff]  ;;  %v1485_v35 = vld [vmem:[#allocation4 + $0x28] sm:$0xff] }
  0x16   :  { %236 = vmatpush.msrb.mxu3 %v1460_v20  ;;  %172 = vmatpush.msra.mxu2 %v79_v21  ;;  %v1479_v33 = vld [vmem:[#allocation4 + $0x58] sm:$0xff]  ;;  %v1481_v34 = vld [vmem:[#allocation4 + $0x40] sm:$0xff]  ;;  %v1489_v36 = vld [vmem:[#allocation4 + $0x10] sm:$0xff] }
  0x17   :  { %127 = vmatpush.msra.mxu0 %v74_v22  ;;  %150 = vmatpush.msra.mxu1 %v75_v23  ;;  %v1527_v44 = vld [vmem:[%s1723_s3] sm:$0x7] }
  0x18   :  { %237 = vmatpush.msrb.mxu3 %v1463_v24  ;;  %173 = vmatpush.msra.mxu2 %v76_v25  ;;  %v91_v45 = vperm.slane %v1527_v44, 0  ;;  %v92_v46 = vperm.slane %v1527_v44, 1  ;;  %v1544_v0 = vld [vmem:[%s1724_s4] ss:$0 sm:$0xff]  ;;  %v93_v12 = vperm.slane %v1527_v44, 2  ;;  %s1397_s4 = smov 32  }
  0x19   :  { %128 = vmatpush.msra.mxu0 %v71_v26  ;;  %151 = vmatpush.msra.mxu1 %v72_v27 }
  0x1a   :  { %238 = vmatpush.msrb.mxu3 %v1466_v28  ;;  %174 = vmatpush.msra.mxu2 %v73_v29 }
  0x1b   :  { %239 = vmatmul.f32.vlgmr.msrb.gmra.mxu3 %v1396_v19  ;;  %129 = vmatpush.msra.mxu0 %v68_v30 }
  0x1c   :  { %152 = vmatpush.msra.mxu1 %v69_v31  ;;  %175 = vmatpush.msra.mxu2 %v70_v32 }
  0x1d   :  { %326 = vmatpush.msrb.mxu0 %v1439_v2  ;;  %255 = vmatpush.msra.mxu3 %v1479_v33 }
  0x1e   :  { %346 = vmatpush.msrb.mxu1 %v1456_v16  ;;  %366 = vmatpush.msrb.mxu2 %v1479_v33 }
  0x1f   :  { %327 = vmatpush.msrb.mxu0 %v1442_v3  ;;  %256 = vmatpush.msra.mxu3 %v1481_v34 }
  0x20   :  { %347 = vmatpush.msrb.mxu1 %v1460_v20  ;;  %367 = vmatpush.msrb.mxu2 %v1481_v34 }
  0x21   :  { %328 = vmatpush.msrb.mxu0 %v1444_v5  ;;  %257 = vmatpush.msra.mxu3 %v1485_v35 }
  0x22   :  { %348 = vmatpush.msrb.mxu1 %v1463_v24  ;;  %368 = vmatpush.msrb.mxu2 %v1485_v35 }
  0x23   :  { %329 = vmatpush.msrb.mxu0 %v1450_v11  ;;  %258 = vmatpush.msra.mxu3 %v1489_v36 }
  0x24   :  { %349 = vmatpush.msrb.mxu1 %v1466_v28  ;;  %369 = vmatpush.msrb.mxu2 %v1489_v36 }
  0x25   :  { %259 = vmatmul.f32.vlgmr.msra.gmra.mxu3 %v1396_v19 }
  0x26   :  { %449 = vmatpush.msrb.mxu3 %v1439_v2 }
  0x28   :  { %450 = vmatpush.msrb.mxu3 %v1442_v3 }
  0x2a   :  { %451 = vmatpush.msrb.mxu3 %v1444_v5 }
  0x2c   :  { %452 = vmatpush.msrb.mxu3 %v1450_v11 }
  0x2e   :  { %592 = vmatpush.msra.mxu3 %v1456_v16 }
  0x30   :  { %593 = vmatpush.msra.mxu3 %v1460_v20 }
  0x32   :  { %594 = vmatpush.msra.mxu3 %v1463_v24 }
  0x34   :  { %595 = vmatpush.msra.mxu3 %v1466_v28 }
  0x7f   :  { %v58_v39 = vpop.permute.xlu0 %57 }
  0x80   :  { %vm62_vm2 = vcmp.eq.s32.totalorder %v58_v39, %v53_v38 }
  0x81   :  { %v1200_v40 = vsel %vm62_vm2, 1.0, %v1396_v19 }
  0x82   :  { %1203 = vmatmul.msk.f32.vlgmr.msra.gmra.mxu0 %vm97_vm1, %v1200_v40  ;;  %1206 = vmatmul.msk.f32.vlgmr.msra.gmra.mxu1 %vm97_vm1, %v1200_v40 }
  0x83   :  { %1209 = vmatmul.msk.f32.vlgmr.msra.gmra.mxu2 %vm97_vm1, %v1200_v40  ;;  %469 = vmatpush.msra.mxu0 %v1456_v16 }
  0x84   :  { %489 = vmatpush.msra.mxu1 %v1479_v33  ;;  %572 = vmatpush.msra.mxu2 %v1439_v2 }
  0x85   :  { %470 = vmatpush.msra.mxu0 %v1460_v20 }
  0x86   :  { %490 = vmatpush.msra.mxu1 %v1481_v34  ;;  %573 = vmatpush.msra.mxu2 %v1442_v3 }
  0x87   :  { %v61_v41 = vpop.permute.xlu0 %60  ;;  %471 = vmatpush.msra.mxu0 %v1463_v24 }
  0x88   :  { %vm63_vm3 = vcmp.eq.s32.totalorder %v61_v41, %v53_v38  ;;  %491 = vmatpush.msra.mxu1 %v1485_v35  ;;  %574 = vmatpush.msra.mxu2 %v1444_v5 }
  0x89   :  { %v1201_v42 = vsel %vm63_vm3, 1.0, %v1396_v19  ;;  %472 = vmatpush.msra.mxu0 %v1466_v28 }
  0x8a   :  { %1204 = vmatmul.msk.f32.gmra.mxu0 %vm97_vm1, %v1201_v42  ;;  %1207 = vmatmul.msk.f32.gmra.mxu1 %vm97_vm1, %v1201_v42 }
  0x8b   :  { %1210 = vmatmul.msk.f32.gmra.mxu2 %vm97_vm1, %v1201_v42  ;;  %492 = vmatpush.msra.mxu1 %v1489_v36 }
  0x8c   :  { %575 = vmatpush.msra.mxu2 %v1450_v11 }
  0x96   :  { %v220_v43 = vpop.f32.mrf.mxu3 }
  0x9e   :  { %v240_v47 = vpop.f32.mrf.mxu3 }
  0xa8   :  { %v260_v6 = vpop.f32.mrf.mxu3 }
  0xa9   :  { %v303_v14 = vadd.f32 %v1544_v0, %v260_v6 }
  0xff   :  { %v131_v48 = vpop.f32.mrf.mxu0  ;;  %v154_v49 = vpop.f32.mrf.mxu1 }
 0x100   :  { %v1533_v50 = vadd.f32 %v131_v48, %v91_v45  ;;  %v1537_v51 = vadd.f32 %v154_v49, %v92_v46 }
 0x102   :  { %v263_v52 = vadd.f32 %v220_v43, %v1533_v50  ;;  %v283_v53 = vadd.f32 %v240_v47, %v1537_v51 }
 0x104   :  { %v1211_v54 = vmul.f32 -1.442695, %v263_v52  ;;  %v1212_v55 = vmul.f32 -1.442695, %v283_v53 }
 0x106   :  { %1259 = vpow2.f32 %v1211_v54  ;;  %v177_v15 = vpop.f32.mrf.mxu2 }
 0x107   :  { %1261 = vpow2.f32 %v1212_v55  ;;  %v1550_v23 = vadd.f32 %v177_v15, %v93_v12  ;;  %v1573_v41 = vpop.f32.mrf.mxu0  ;;  %v1575_v42 = vpop.f32.mrf.mxu1 }
 0x10c   :  { %v1260_v56 = vpop.eup %1259 }
 0x10d   :  { %v1262_v57 = vpop.eup %1261  ;;  %v267_v58 = vadd.f32 1.0, %v1260_v56 }
 0x10e   :  { %v287_v59 = vadd.f32 1.0, %v1262_v57 }
 0x10f   :  { %1263 = vrcp.f32 %v267_v58  ;;  %v279_v7 = vand.u32 2147483648, %v267_v58  ;;  %v277_v9 = vand.u32 2147483647, %v267_v58  ;;  %vm273_vm5 = vweird.f32 %v267_v58 }
 0x110   :  { %1265 = vrcp.f32 %v287_v59  ;;  %v299_v22 = vand.u32 2147483648, %v287_v59  ;;  %vm293_vm9 = vweird.f32 %v287_v59  ;;  %v297_v26 = vand.u32 2147483647, %v287_v59 }
 0x111   :  { %v280_v17 = vor.u32 1.1754944e-38, %v279_v7  ;;  %vm278_vm7 = vcmp.eq.f32.partialorder %v277_v9, 8.507059e+37 }
 0x112   :  { %v300_v30 = vor.u32 1.1754944e-38, %v299_v22  ;;  %vm298_vm11 = vcmp.eq.f32.partialorder %v297_v26, 8.507059e+37 }
 0x115   :  { %v1264_v60 = vpop.eup %1263 }
 0x116   :  { %v1266_v61 = vpop.eup %1265  ;;  %v269_v62 = vmul.f32 %v1264_v60, %v267_v58  ;;  %vm274_vm4 = vweird.f32 %v1264_v60 }
 0x117   :  { %v289_v63 = vmul.f32 %v1266_v61, %v287_v59  ;;  %vm275_vm6 = vmor %vm273_vm5, %vm274_vm4  ;;  %vm294_vm8 = vweird.f32 %v1266_v61 }
 0x118   :  { %v270_v1 = vsub.f32 1.0, %v269_v62  ;;  %vm295_vm10 = vmor %vm293_vm9, %vm294_vm8 }
 0x119   :  { %v290_v4 = vsub.f32 1.0, %v289_v63 }
 0x11a   :  { %v271_v8 = vmul.f32 %v1264_v60, %v270_v1 }
 0x11b   :  { %v291_v10 = vmul.f32 %v1266_v61, %v290_v4 }
 0x11c   :  { %v272_v13 = vadd.f32 %v1264_v60, %v271_v8 }
 0x11d   :  { %v292_v19 = vadd.f32 %v1266_v61, %v291_v10 }
 0x11e   :  { %v276_v18 = vsel %vm275_vm6, %v1264_v60, %v272_v13  ;;  %v1579_v60 = vpop.f32.mrf.mxu2 }
 0x11f   :  { %v281_v21 = vsel %vm278_vm7, %v280_v17, %v276_v18  ;;  %v296_v29 = vsel %vm295_vm10, %v1266_v61, %v292_v19 }
 0x120   :  { %v304_v25 = vmul.f32 %v303_v14, %v281_v21  ;;  %v301_v31 = vsel %vm298_vm11, %v300_v30, %v296_v29 }
 0x121   :  { %v307_v32 = vsub.f32 1.0, %v301_v31  ;;  %v309_v39 = vmul.f32 0.0, %v301_v31 }
 0x122   :  { %v305_v27 = vadd.f32 %v304_v25, %v1550_v23 }
 0x124   :  { %1267 = vtanh.f32 %v305_v27 }
 0x12a   :  { %v1268_v37 = vpop.eup %1267 }
 0x12b   :  { %v308_v38 = vmul.f32 %v1268_v37, %v307_v32 }
 0x12d   :  { %v1553_v40 = vadd.f32 %v309_v39, %v308_v38 }
 0x12f   :  { %1213 = vmatmul.msk.f32.vlgmr.msrb.gmra.mxu0 %vm199_vm12, %v1553_v40  ;;  %1214 = vmatmul.msk.f32.vlgmr.msrb.gmra.mxu1 %vm199_vm12, %v1553_v40  ;;  %v429_v38 = vrot.slane %v1553_v40, 6 }
 0x130   :  { %1215 = vmatmul.msk.f32.vlgmr.msrb.gmra.mxu2 %vm199_vm12, %v1553_v40  ;;  %612 = vmatpush.msrb.mxu0 %v1479_v33 }
 0x131   :  { %695 = vmatpush.msrb.mxu1 %v1439_v2  ;;  %715 = vmatpush.msrb.mxu2 %v1456_v16 }
 0x132   :  { %613 = vmatpush.msrb.mxu0 %v1481_v34 }
 0x133   :  { %696 = vmatpush.msrb.mxu1 %v1442_v3  ;;  %716 = vmatpush.msrb.mxu2 %v1460_v20 }
 0x134   :  { %614 = vmatpush.msrb.mxu0 %v1485_v35 }
 0x135   :  { %697 = vmatpush.msrb.mxu1 %v1444_v5  ;;  %717 = vmatpush.msrb.mxu2 %v1463_v24 }
 0x136   :  { %615 = vmatpush.msrb.mxu0 %v1489_v36 }
 0x137   :  { %698 = vmatpush.msrb.mxu1 %v1450_v11  ;;  %718 = vmatpush.msrb.mxu2 %v1466_v28 }
 0x1ac   :  { %v331_v43 = vpop.f32.mrf.mxu0  ;;  %v351_v47 = vpop.f32.mrf.mxu1 }
 0x1ad   :  { %v375_v48 = vrot.slane %v331_v43, 6  ;;  %v398_v49 = vrot.slane %v351_v47, 6 }
 0x1af   :  { %v377_v52 = vadd.f32 %v375_v48, %v1533_v50  ;;  %v400_v53 = vadd.f32 %v398_v49, %v1537_v51 }
 0x1b1   :  { %v1216_v54 = vmul.f32 -1.442695, %v377_v52  ;;  %v1217_v55 = vmul.f32 -1.442695, %v400_v53 }
 0x1b3   :  { %1269 = vpow2.f32 %v1216_v54  ;;  %v371_v4 = vpop.f32.mrf.mxu2 }
 0x1b4   :  { %1271 = vpow2.f32 %v1217_v55  ;;  %v420_v13 = vadd.f32 %v1544_v0, %v371_v4 }
 0x1b6   :  { %v422_v19 = vrot.slane %v420_v13, 6 }
 0x1b9   :  { %v1270_v56 = vpop.eup %1269 }
 0x1ba   :  { %v1272_v57 = vpop.eup %1271  ;;  %v381_v58 = vadd.f32 1.0, %v1270_v56 }
 0x1bb   :  { %v404_v59 = vadd.f32 1.0, %v1272_v57 }
 0x1bc   :  { %1273 = vrcp.f32 %v381_v58  ;;  %v393_v8 = vand.u32 2147483648, %v381_v58  ;;  %v391_v10 = vand.u32 2147483647, %v381_v58  ;;  %vm387_vm14 = vweird.f32 %v381_v58 }
 0x1bd   :  { %1275 = vrcp.f32 %v404_v59  ;;  %v416_v26 = vand.u32 2147483648, %v404_v59  ;;  %vm410_vm3 = vweird.f32 %v404_v59  ;;  %v414_v27 = vand.u32 2147483647, %v404_v59 }
 0x1be   :  { %v394_v17 = vor.u32 1.1754944e-38, %v393_v8  ;;  %vm392_vm1 = vcmp.eq.f32.partialorder %v391_v10, 8.507059e+37 }
 0x1bf   :  { %v417_v31 = vor.u32 1.1754944e-38, %v416_v26  ;;  %vm415_vm5 = vcmp.eq.f32.partialorder %v414_v27, 8.507059e+37 }
 0x1c2   :  { %v1274_v61 = vpop.eup %1273 }
 0x1c3   :  { %v1276_v62 = vpop.eup %1275  ;;  %v383_v63 = vmul.f32 %v1274_v61, %v381_v58  ;;  %vm388_vm13 = vweird.f32 %v1274_v61 }
 0x1c4   :  { %v406_v1 = vmul.f32 %v1276_v62, %v404_v59  ;;  %vm389_vm15 = vmor %vm387_vm14, %vm388_vm13  ;;  %vm411_vm2 = vweird.f32 %v1276_v62 }
 0x1c5   :  { %v384_v6 = vsub.f32 1.0, %v383_v63  ;;  %vm412_vm4 = vmor %vm410_vm3, %vm411_vm2 }
 0x1c6   :  { %v407_v7 = vsub.f32 1.0, %v406_v1 }
 0x1c7   :  { %v385_v9 = vmul.f32 %v1274_v61, %v384_v6 }
 0x1c8   :  { %v408_v14 = vmul.f32 %v1276_v62, %v407_v7 }
 0x1c9   :  { %v386_v15 = vadd.f32 %v1274_v61, %v385_v9 }
 0x1ca   :  { %v409_v22 = vadd.f32 %v1276_v62, %v408_v14 }
 0x1cb   :  { %v390_v18 = vsel %vm389_vm15, %v1274_v61, %v386_v15 }
 0x1cc   :  { %v395_v21 = vsel %vm392_vm1, %v394_v17, %v390_v18  ;;  %v413_v30 = vsel %vm412_vm4, %v1276_v62, %v409_v22 }
 0x1cd   :  { %v424_v25 = vmul.f32 %v422_v19, %v395_v21  ;;  %v418_v32 = vsel %vm415_vm5, %v417_v31, %v413_v30 }
 0x1ce   :  { %v427_v37 = vsub.f32 1.0, %v418_v32  ;;  %v431_v47 = vmul.f32 %v429_v38, %v418_v32 }
 0x1cf   :  { %v425_v29 = vadd.f32 %v424_v25, %v1550_v23 }
 0x1d1   :  { %1277 = vtanh.f32 %v425_v29 }
 0x1d7   :  { %v1278_v39 = vpop.eup %1277 }
 0x1d8   :  { %v428_v43 = vmul.f32 %v1278_v39, %v427_v37 }
 0x1da   :  { %v1584_v48 = vadd.f32 %v431_v47, %v428_v43 }
 0x1dc   :  { %v434_v49 = vrot.slane %v1584_v48, 2  ;;  %v552_v47 = vrot.slane %v1584_v48, 6 }
 0x1de   :  { %1160 = vrot.lane.b32.xlu2 %v434_v49, %s1397_s4  ;;  %1218 = vmatmul.msk.f32.vlgmr.msrb.gmra.mxu3 %vm199_vm12, %v434_v49 }
 0x1df   :  { %1219 = vmatmul.msk.f32.vlgmr.msra.gmra.mxu0 %vm199_vm12, %v434_v49  ;;  %1220 = vmatmul.msk.f32.vlgmr.msra.gmra.mxu1 %vm199_vm12, %v434_v49 }
 0x1e0   :  { %735 = vmatpush.msrb.mxu3 %v1479_v33  ;;  %807 = vmatpush.msra.mxu0 %v1439_v2 }
 0x1e1   :  { %827 = vmatpush.msra.mxu1 %v1456_v16 }
 0x1e2   :  { %736 = vmatpush.msrb.mxu3 %v1481_v34  ;;  %808 = vmatpush.msra.mxu0 %v1442_v3 }
 0x1e3   :  { %828 = vmatpush.msra.mxu1 %v1460_v20 }
 0x1e4   :  { %737 = vmatpush.msrb.mxu3 %v1485_v35  ;;  %809 = vmatpush.msra.mxu0 %v1444_v5 }
 0x1e5   :  { %829 = vmatpush.msra.mxu1 %v1463_v24 }
 0x1e6   :  { %738 = vmatpush.msrb.mxu3 %v1489_v36  ;;  %810 = vmatpush.msra.mxu0 %v1450_v11 }
 0x1e7   :  { %830 = vmatpush.msra.mxu1 %v1466_v28 }
 0x25c   :  { %v474_v52 = vpop.f32.mrf.mxu0  ;;  %v494_v10 = vpop.f32.mrf.mxu1 }
 0x25d   :  { %v521_v53 = vrot.slane %v474_v52, 4  ;;  %v543_v15 = vadd.f32 %v1544_v0, %v494_v10 }
 0x25f   :  { %v523_v54 = vadd.f32 %v521_v53, %v1537_v51  ;;  %v545_v25 = vrot.slane %v543_v15, 4 }
 0x261   :  { %v1222_v55 = vmul.f32 -1.442695, %v523_v54  ;;  %v454_v56 = vpop.f32.mrf.mxu3 }
 0x262   :  { %v498_v57 = vrot.slane %v454_v56, 4 }
 0x263   :  { %1279 = vpow2.f32 %v1222_v55 }
 0x264   :  { %v500_v58 = vadd.f32 %v498_v57, %v1533_v50 }
 0x266   :  { %v1221_v59 = vmul.f32 -1.442695, %v500_v58 }
 0x268   :  { %1281 = vpow2.f32 %v1221_v59 }
 0x269   :  { %v1280_v61 = vpop.eup %1279 }
 0x26a   :  { %v527_v62 = vadd.f32 1.0, %v1280_v61 }
 0x26c   :  { %1283 = vrcp.f32 %v527_v62  ;;  %v539_v30 = vand.u32 2147483648, %v527_v62  ;;  %vm533_vm11 = vweird.f32 %v527_v62  ;;  %v537_v32 = vand.u32 2147483647, %v527_v62 }
 0x26e   :  { %v1282_v63 = vpop.eup %1281  ;;  %v540_v39 = vor.u32 1.1754944e-38, %v539_v30  ;;  %vm538_vm14 = vcmp.eq.f32.partialorder %v537_v32, 8.507059e+37 }
 0x26f   :  { %v504_v1 = vadd.f32 1.0, %v1282_v63 }
 0x271   :  { %1285 = vrcp.f32 %v504_v1  ;;  %v516_v14 = vand.u32 2147483648, %v504_v1  ;;  %v514_v18 = vand.u32 2147483647, %v504_v1  ;;  %vm510_vm7 = vweird.f32 %v504_v1 }
 0x272   :  { %v1284_v4 = vpop.eup %1283 }
 0x273   :  { %v529_v6 = vmul.f32 %v1284_v4, %v527_v62  ;;  %v517_v22 = vor.u32 1.1754944e-38, %v516_v14  ;;  %vm515_vm9 = vcmp.eq.f32.partialorder %v514_v18, 8.507059e+37  ;;  %vm534_vm10 = vweird.f32 %v1284_v4 }
 0x274   :  { %vm535_vm13 = vmor %vm533_vm11, %vm534_vm10 }
 0x275   :  { %v530_v9 = vsub.f32 1.0, %v529_v6 }
 0x277   :  { %v1286_v7 = vpop.eup %1285  ;;  %v531_v19 = vmul.f32 %v1284_v4, %v530_v9 }
 0x278   :  { %v506_v8 = vmul.f32 %v1286_v7, %v504_v1  ;;  %vm511_vm6 = vweird.f32 %v1286_v7 }
 0x279   :  { %vm512_vm8 = vmor %vm510_vm7, %vm511_vm6  ;;  %v532_v29 = vadd.f32 %v1284_v4, %v531_v19 }
 0x27a   :  { %v507_v13 = vsub.f32 1.0, %v506_v8 }
 0x27b   :  { %v536_v38 = vsel %vm535_vm13, %v1284_v4, %v532_v29 }
 0x27c   :  { %v508_v17 = vmul.f32 %v1286_v7, %v507_v13  ;;  %v541_v43 = vsel %vm538_vm14, %v540_v39, %v536_v38 }
 0x27d   :  { %v550_v49 = vsub.f32 1.0, %v541_v43  ;;  %v554_v54 = vmul.f32 %v552_v47, %v541_v43 }
 0x27e   :  { %v509_v21 = vadd.f32 %v1286_v7, %v508_v17 }
 0x280   :  { %v513_v26 = vsel %vm512_vm8, %v1286_v7, %v509_v21 }
 0x281   :  { %v518_v27 = vsel %vm515_vm9, %v517_v22, %v513_v26 }
 0x282   :  { %v547_v31 = vmul.f32 %v545_v25, %v518_v27 }
 0x284   :  { %v548_v37 = vadd.f32 %v547_v31, %v1550_v23 }
 0x286   :  { %1287 = vtanh.f32 %v548_v37 }
 0x28c   :  { %v1288_v52 = vpop.eup %1287 }
 0x28d   :  { %v551_v53 = vmul.f32 %v1288_v52, %v550_v49 }
 0x28f   :  { %v1608_v55 = vadd.f32 %v554_v54, %v551_v53 }
 0x291   :  { %v557_v56 = vrot.slane %v1608_v55, 4  ;;  %v675_v52 = vrot.slane %v1608_v55, 6 }
 0x293   :  { %1163 = vrot.lane.b32.xlu0 %v557_v56, %s1398_s9  ;;  %1223 = vmatmul.msk.f32.vlgmr.msra.gmra.mxu2 %vm199_vm12, %v557_v56 }
 0x294   :  { %1224 = vmatmul.msk.f32.vlgmr.msra.gmra.mxu3 %vm199_vm12, %v557_v56  ;;  %1225 = vmatmul.msk.f32.vlgmr.msrb.gmra.mxu0 %vm199_vm12, %v557_v56 }
 0x295   :  { %847 = vmatpush.msra.mxu2 %v1479_v33  ;;  %930 = vmatpush.msra.mxu3 %v1439_v2 }
 0x296   :  { %950 = vmatpush.msrb.mxu0 %v1456_v16 }
 0x297   :  { %848 = vmatpush.msra.mxu2 %v1481_v34  ;;  %931 = vmatpush.msra.mxu3 %v1442_v3 }
 0x298   :  { %951 = vmatpush.msrb.mxu0 %v1460_v20 }
 0x299   :  { %849 = vmatpush.msra.mxu2 %v1485_v35  ;;  %932 = vmatpush.msra.mxu3 %v1444_v5 }
 0x29a   :  { %952 = vmatpush.msrb.mxu0 %v1463_v24 }
 0x29b   :  { %850 = vmatpush.msra.mxu2 %v1489_v36  ;;  %933 = vmatpush.msra.mxu3 %v1450_v11 }
 0x29c   :  { %953 = vmatpush.msrb.mxu0 %v1466_v28 }
 0x311   :  { %v617_v14 = vpop.f32.mrf.mxu0 }
 0x316   :  { %v577_v48 = vpop.f32.mrf.mxu2 }
 0x317   :  { %v621_v57 = vrot.slane %v577_v48, 2  ;;  %v597_v58 = vpop.f32.mrf.mxu3 }
 0x318   :  { %v644_v59 = vrot.slane %v597_v58, 2 }
 0x319   :  { %v623_v61 = vadd.f32 %v621_v57, %v1533_v50 }
 0x31a   :  { %v646_v62 = vadd.f32 %v644_v59, %v1537_v51  ;;  %v666_v51 = vadd.f32 %v1544_v0, %v617_v14  ;;  %v1668_v14 = vadd.f32 %v1579_v60, %v93_v12 }
 0x31b   :  { %v1226_v63 = vmul.f32 -1.442695, %v623_v61 }
 0x31c   :  { %v1227_v1 = vmul.f32 -1.442695, %v646_v62  ;;  %v668_v27 = vrot.slane %v666_v51, 2 }
 0x31d   :  { %1289 = vpow2.f32 %v1226_v63 }
 0x31e   :  { %1291 = vpow2.f32 %v1227_v1 }
 0x323   :  { %v1290_v4 = vpop.eup %1289 }
 0x324   :  { %v1292_v6 = vpop.eup %1291  ;;  %v627_v7 = vadd.f32 1.0, %v1290_v4 }
 0x325   :  { %v650_v8 = vadd.f32 1.0, %v1292_v6 }
 0x326   :  { %1293 = vrcp.f32 %v627_v7  ;;  %v639_v18 = vand.u32 2147483648, %v627_v7  ;;  %v637_v21 = vand.u32 2147483647, %v627_v7  ;;  %vm633_vm1 = vweird.f32 %v627_v7 }
 0x327   :  { %1295 = vrcp.f32 %v650_v8  ;;  %v662_v37 = vand.u32 2147483648, %v650_v8  ;;  %vm656_vm5 = vweird.f32 %v650_v8  ;;  %v660_v38 = vand.u32 2147483647, %v650_v8 }
 0x328   :  { %v640_v26 = vor.u32 1.1754944e-38, %v639_v18  ;;  %vm638_vm3 = vcmp.eq.f32.partialorder %v637_v21, 8.507059e+37 }
 0x329   :  { %v663_v47 = vor.u32 1.1754944e-38, %v662_v37  ;;  %vm661_vm7 = vcmp.eq.f32.partialorder %v660_v38, 8.507059e+37 }
 0x32c   :  { %v1294_v9 = vpop.eup %1293 }
 0x32d   :  { %v1296_v10 = vpop.eup %1295  ;;  %v629_v13 = vmul.f32 %v1294_v9, %v627_v7  ;;  %vm634_vm15 = vweird.f32 %v1294_v9 }
 0x32e   :  { %v652_v15 = vmul.f32 %v1296_v10, %v650_v8  ;;  %vm635_vm2 = vmor %vm633_vm1, %vm634_vm15  ;;  %vm657_vm4 = vweird.f32 %v1296_v10 }
 0x32f   :  { %v630_v17 = vsub.f32 1.0, %v629_v13  ;;  %vm658_vm6 = vmor %vm656_vm5, %vm657_vm4 }
 0x330   :  { %v653_v50 = vsub.f32 1.0, %v652_v15 }
 0x331   :  { %v631_v19 = vmul.f32 %v1294_v9, %v630_v17 }
 0x332   :  { %v654_v22 = vmul.f32 %v1296_v10, %v653_v50 }
 0x333   :  { %v632_v25 = vadd.f32 %v1294_v9, %v631_v19 }
 0x334   :  { %v655_v31 = vadd.f32 %v1296_v10, %v654_v22 }
 0x335   :  { %v636_v29 = vsel %vm635_vm2, %v1294_v9, %v632_v25 }
 0x336   :  { %v641_v30 = vsel %vm638_vm3, %v640_v26, %v636_v29  ;;  %v659_v43 = vsel %vm658_vm6, %v1296_v10, %v655_v31 }
 0x337   :  { %v670_v32 = vmul.f32 %v668_v27, %v641_v30  ;;  %v664_v49 = vsel %vm661_vm7, %v663_v47, %v659_v43 }
 0x338   :  { %v673_v53 = vsub.f32 1.0, %v664_v49  ;;  %v677_v48 = vmul.f32 %v675_v52, %v664_v49 }
 0x339   :  { %v671_v39 = vadd.f32 %v670_v32, %v1550_v23 }
 0x33b   :  { %1297 = vtanh.f32 %v671_v39 }
 0x341   :  { %v1298_v54 = vpop.eup %1297 }
 0x342   :  { %v674_v56 = vmul.f32 %v1298_v54, %v673_v53 }
 0x344   :  { %v678_v57 = vadd.f32 %v677_v48, %v674_v56 }
 0x346   :  { %v1632_v58 = vrot.slane %v678_v57, 6 }
 0x348   :  { %1228 = vmatmul.msk.f32.vlgmr.msrb.gmra.mxu1 %vm199_vm12, %v1632_v58  ;;  %1229 = vmatmul.msk.f32.vlgmr.msrb.gmra.mxu2 %vm199_vm12, %v1632_v58 }
 0x349   :  { %1230 = vmatmul.msk.f32.vlgmr.msrb.gmra.mxu3 %vm199_vm12, %v1632_v58  ;;  %970 = vmatpush.msrb.mxu1 %v1479_v33 }
 0x34a   :  { %1053 = vmatpush.msrb.mxu2 %v1439_v2  ;;  %1073 = vmatpush.msrb.mxu3 %v1456_v16  ;;  %v1655_v2 = vadd.f32 %v1573_v41, %v91_v45 }
 0x34b   :  { %971 = vmatpush.msrb.mxu1 %v1481_v34 }
 0x34c   :  { %1054 = vmatpush.msrb.mxu2 %v1442_v3  ;;  %1074 = vmatpush.msrb.mxu3 %v1460_v20 }
 0x34d   :  { %972 = vmatpush.msrb.mxu1 %v1485_v35 }
 0x34e   :  { %1055 = vmatpush.msrb.mxu2 %v1444_v5  ;;  %1075 = vmatpush.msrb.mxu3 %v1463_v24  ;;  %v1661_v5 = vadd.f32 %v1575_v42, %v92_v46 }
 0x34f   :  { %973 = vmatpush.msrb.mxu1 %v1489_v36 }
 0x350   :  { %1056 = vmatpush.msrb.mxu2 %v1450_v11  ;;  %1076 = vmatpush.msrb.mxu3 %v1466_v28 }
 0x3c5   :  { %v700_v3 = vpop.f32.mrf.mxu1 }
 0x3c6   :  { %v743_v16 = vadd.f32 %v700_v3, %v1655_v2 }
 0x3c8   :  { %v1231_v20 = vmul.f32 -1.442695, %v743_v16 }
 0x3ca   :  { %1299 = vpow2.f32 %v1231_v20 }
 0x3cb   :  { %v720_v24 = vpop.f32.mrf.mxu2 }
 0x3cc   :  { %v763_v11 = vadd.f32 %v720_v24, %v1661_v5  ;;  %v740_v4 = vpop.f32.mrf.mxu3 }
 0x3cd   :  { %v783_v13 = vadd.f32 %v1544_v0, %v740_v4 }
 0x3ce   :  { %v1232_v23 = vmul.f32 -1.442695, %v763_v11 }
 0x3d0   :  { %v1300_v28 = vpop.eup %1299  ;;  %1301 = vpow2.f32 %v1232_v23 }
 0x3d1   :  { %v747_v55 = vadd.f32 1.0, %v1300_v28 }
 0x3d3   :  { %1303 = vrcp.f32 %v747_v55  ;;  %v759_v63 = vand.u32 2147483648, %v747_v55  ;;  %v757_v46 = vand.u32 2147483647, %v747_v55  ;;  %vm753_vm9 = vweird.f32 %v747_v55 }
 0x3d5   :  { %v760_v8 = vor.u32 1.1754944e-38, %v759_v63  ;;  %vm758_vm11 = vcmp.eq.f32.partialorder %v757_v46, 8.507059e+37 }
 0x3d6   :  { %v1302_v45 = vpop.eup %1301 }
 0x3d7   :  { %v767_v41 = vadd.f32 1.0, %v1302_v45 }
 0x3d9   :  { %v1304_v59 = vpop.eup %1303  ;;  %1305 = vrcp.f32 %v767_v41  ;;  %v779_v18 = vand.u32 2147483648, %v767_v41  ;;  %v777_v51 = vand.u32 2147483647, %v767_v41  ;;  %vm773_vm14 = vweird.f32 %v767_v41 }
 0x3da   :  { %v749_v61 = vmul.f32 %v1304_v59, %v747_v55  ;;  %vm754_vm8 = vweird.f32 %v1304_v59 }
 0x3db   :  { %vm755_vm10 = vmor %vm753_vm9, %vm754_vm8  ;;  %v780_v22 = vor.u32 1.1754944e-38, %v779_v18  ;;  %vm778_vm1 = vcmp.eq.f32.partialorder %v777_v51, 8.507059e+37 }
 0x3dc   :  { %v750_v62 = vsub.f32 1.0, %v749_v61 }
 0x3de   :  { %v751_v1 = vmul.f32 %v1304_v59, %v750_v62 }
 0x3df   :  { %v1306_v42 = vpop.eup %1305 }
 0x3e0   :  { %v769_v6 = vmul.f32 %v1306_v42, %v767_v41  ;;  %v752_v7 = vadd.f32 %v1304_v59, %v751_v1  ;;  %vm774_vm13 = vweird.f32 %v1306_v42 }
 0x3e1   :  { %vm775_vm15 = vmor %vm773_vm14, %vm774_vm13 }
 0x3e2   :  { %v770_v9 = vsub.f32 1.0, %v769_v6  ;;  %v756_v10 = vsel %vm755_vm10, %v1304_v59, %v752_v7 }
 0x3e3   :  { %v761_v15 = vsel %vm758_vm11, %v760_v8, %v756_v10 }
 0x3e4   :  { %v771_v17 = vmul.f32 %v1306_v42, %v770_v9  ;;  %v784_v50 = vmul.f32 %v783_v13, %v761_v15 }
 0x3e6   :  { %v772_v19 = vadd.f32 %v1306_v42, %v771_v17  ;;  %v785_v21 = vadd.f32 %v784_v50, %v1668_v14 }
 0x3e8   :  { %v776_v25 = vsel %vm775_vm15, %v1306_v42, %v772_v19  ;;  %1307 = vtanh.f32 %v785_v21 }
 0x3e9   :  { %v781_v26 = vsel %vm778_vm1, %v780_v22, %v776_v25 }
 0x3ea   :  { %v787_v44 = vsub.f32 1.0, %v781_v26  ;;  %v790_v60 = vmul.f32 %v781_v26, %v1632_v58 }
 0x3ee   :  { %v1308_v27 = vpop.eup %1307 }
 0x3ef   :  { %v788_v12 = vmul.f32 %v1308_v27, %v787_v44 }
 0x3f1   :  { %v1672_v29 = vadd.f32 %v790_v60, %v788_v12 }
 0x3f3   :  { %1233 = vmatmul.msk.f32.vlgmr.msra.gmra.mxu0 %vm199_vm12, %v1672_v29  ;;  %1234 = vmatmul.msk.f32.vlgmr.msra.gmra.mxu1 %vm199_vm12, %v1672_v29  ;;  %v910_v7 = vrot.slane %v1672_v29, 6 }
 0x3f4   :  { %1235 = vmatmul.msk.f32.vlgmr.msra.gmra.mxu2 %vm199_vm12, %v1672_v29  ;;  %1093 = vmatpush.msra.mxu0 %v1479_v33 }
 0x3f6   :  { %1094 = vmatpush.msra.mxu0 %v1481_v34 }
 0x3f8   :  { %1095 = vmatpush.msra.mxu0 %v1485_v35 }
 0x3fa   :  { %1096 = vmatpush.msra.mxu0 %v1489_v36 }
 0x470   :  { %v812_v30 = vpop.f32.mrf.mxu0  ;;  %v832_v31 = vpop.f32.mrf.mxu1 }
 0x471   :  { %v856_v32 = vrot.slane %v812_v30, 6  ;;  %v879_v37 = vrot.slane %v832_v31, 6 }
 0x473   :  { %v858_v38 = vadd.f32 %v856_v32, %v1655_v2  ;;  %v881_v39 = vadd.f32 %v879_v37, %v1661_v5 }
 0x475   :  { %v1236_v43 = vmul.f32 -1.442695, %v858_v38  ;;  %v1237_v47 = vmul.f32 -1.442695, %v881_v39 }
 0x477   :  { %1309 = vpow2.f32 %v1236_v43  ;;  %v852_v56 = vpop.f32.mrf.mxu2 }
 0x478   :  { %1311 = vpow2.f32 %v1237_v47  ;;  %v901_v24 = vadd.f32 %v1544_v0, %v852_v56 }
 0x47a   :  { %v903_v45 = vrot.slane %v901_v24, 6 }
 0x47d   :  { %v1310_v49 = vpop.eup %1309 }
 0x47e   :  { %v1312_v33 = vpop.eup %1311  ;;  %v862_v52 = vadd.f32 1.0, %v1310_v49 }
 0x47f   :  { %v885_v34 = vadd.f32 1.0, %v1312_v33 }
 0x480   :  { %1313 = vrcp.f32 %v862_v52  ;;  %v874_v3 = vand.u32 2147483648, %v862_v52  ;;  %v872_v20 = vand.u32 2147483647, %v862_v52  ;;  %vm868_vm3 = vweird.f32 %v862_v52 }
 0x481   :  { %1315 = vrcp.f32 %v885_v34  ;;  %v897_v62 = vand.u32 2147483648, %v885_v34  ;;  %vm891_vm7 = vweird.f32 %v885_v34  ;;  %v895_v63 = vand.u32 2147483647, %v885_v34 }
 0x482   :  { %v875_v28 = vor.u32 1.1754944e-38, %v874_v3  ;;  %vm873_vm5 = vcmp.eq.f32.partialorder %v872_v20, 8.507059e+37 }
 0x483   :  { %v898_v42 = vor.u32 1.1754944e-38, %v897_v62  ;;  %vm896_vm9 = vcmp.eq.f32.partialorder %v895_v63, 8.507059e+37 }
 0x486   :  { %v1314_v35 = vpop.eup %1313 }
 0x487   :  { %v1316_v36 = vpop.eup %1315  ;;  %v864_v53 = vmul.f32 %v1314_v35, %v862_v52  ;;  %vm869_vm2 = vweird.f32 %v1314_v35 }
 0x488   :  { %v887_v54 = vmul.f32 %v1316_v36, %v885_v34  ;;  %vm870_vm4 = vmor %vm868_vm3, %vm869_vm2  ;;  %vm892_vm6 = vweird.f32 %v1316_v36 }
 0x489   :  { %v865_v48 = vsub.f32 1.0, %v864_v53  ;;  %vm893_vm8 = vmor %vm891_vm7, %vm892_vm6 }
 0x48a   :  { %v888_v57 = vsub.f32 1.0, %v887_v54 }
 0x48b   :  { %v866_v16 = vmul.f32 %v1314_v35, %v865_v48 }
 0x48c   :  { %v889_v11 = vmul.f32 %v1316_v36, %v888_v57 }
 0x48d   :  { %v867_v23 = vadd.f32 %v1314_v35, %v866_v16 }
 0x48e   :  { %v890_v59 = vadd.f32 %v1316_v36, %v889_v11 }
 0x48f   :  { %v871_v55 = vsel %vm870_vm4, %v1314_v35, %v867_v23 }
 0x490   :  { %v876_v41 = vsel %vm873_vm5, %v875_v28, %v871_v55  ;;  %v894_v46 = vsel %vm893_vm8, %v1316_v36, %v890_v59 }
 0x491   :  { %v905_v61 = vmul.f32 %v903_v45, %v876_v41  ;;  %v899_v4 = vsel %vm896_vm9, %v898_v42, %v894_v46 }
 0x492   :  { %v908_v6 = vsub.f32 1.0, %v899_v4  ;;  %v912_v10 = vmul.f32 %v910_v7, %v899_v4 }
 0x493   :  { %v906_v1 = vadd.f32 %v905_v61, %v1668_v14 }
 0x495   :  { %1317 = vtanh.f32 %v906_v1 }
 0x49b   :  { %v1318_v8 = vpop.eup %1317 }
 0x49c   :  { %v909_v9 = vmul.f32 %v1318_v8, %v908_v6 }
 0x49e   :  { %v913_v13 = vadd.f32 %v912_v10, %v909_v9 }
 0x4a0   :  { %v915_v15 = vrot.slane %v913_v13, 2  ;;  %v1033_v23 = vrot.slane %v913_v13, 6 }
 0x4a2   :  { %1169 = vrot.lane.b32.xlu1 %v915_v15, %s1397_s4  ;;  %1238 = vmatmul.msk.f32.vlgmr.msra.gmra.mxu3 %vm199_vm12, %v915_v15 }
 0x4a3   :  { %1239 = vmatmul.msk.f32.vlgmr.msrb.gmra.mxu0 %vm199_vm12, %v915_v15  ;;  %1240 = vmatmul.msk.f32.vlgmr.msrb.gmra.mxu1 %vm199_vm12, %v915_v15 }
 0x520   :  { %v955_v17 = vpop.f32.mrf.mxu0  ;;  %v975_v38 = vpop.f32.mrf.mxu1 }
 0x521   :  { %v1002_v18 = vrot.slane %v955_v17, 4  ;;  %v1024_v47 = vadd.f32 %v1544_v0, %v975_v38 }
 0x523   :  { %v1004_v50 = vadd.f32 %v1002_v18, %v1661_v5  ;;  %v1026_v36 = vrot.slane %v1024_v47, 4 }
 0x525   :  { %v1242_v51 = vmul.f32 -1.442695, %v1004_v50  ;;  %v935_v19 = vpop.f32.mrf.mxu3 }
 0x526   :  { %v979_v21 = vrot.slane %v935_v19, 4 }
 0x527   :  { %1319 = vpow2.f32 %v1242_v51 }
 0x528   :  { %v981_v22 = vadd.f32 %v979_v21, %v1655_v2 }
 0x52a   :  { %v1241_v25 = vmul.f32 -1.442695, %v981_v22 }
 0x52c   :  { %1321 = vpow2.f32 %v1241_v25 }
 0x52d   :  { %v1320_v26 = vpop.eup %1319 }
 0x52e   :  { %v1008_v44 = vadd.f32 1.0, %v1320_v26 }
 0x530   :  { %1323 = vrcp.f32 %v1008_v44  ;;  %v1020_v48 = vand.u32 2147483648, %v1008_v44  ;;  %vm1014_vm1 = vweird.f32 %v1008_v44  ;;  %v1018_v3 = vand.u32 2147483647, %v1008_v44 }
 0x532   :  { %v1322_v27 = vpop.eup %1321  ;;  %v1021_v24 = vor.u32 1.1754944e-38, %v1020_v48  ;;  %vm1019_vm3 = vcmp.eq.f32.partialorder %v1018_v3, 8.507059e+37 }
 0x533   :  { %v985_v12 = vadd.f32 1.0, %v1322_v27 }
 0x535   :  { %1325 = vrcp.f32 %v985_v12  ;;  %v997_v43 = vand.u32 2147483648, %v985_v12  ;;  %v995_v33 = vand.u32 2147483647, %v985_v12  ;;  %vm991_vm11 = vweird.f32 %v985_v12 }
 0x536   :  { %v1324_v60 = vpop.eup %1323 }
 0x537   :  { %v1010_v30 = vmul.f32 %v1324_v60, %v1008_v44  ;;  %v998_v35 = vor.u32 1.1754944e-38, %v997_v43  ;;  %vm996_vm14 = vcmp.eq.f32.partialorder %v995_v33, 8.507059e+37  ;;  %vm1015_vm15 = vweird.f32 %v1324_v60 }
 0x538   :  { %vm1016_vm2 = vmor %vm1014_vm1, %vm1015_vm15 }
 0x539   :  { %v1011_v37 = vsub.f32 1.0, %v1010_v30 }
 0x53b   :  { %v1326_v31 = vpop.eup %1325  ;;  %v1012_v52 = vmul.f32 %v1324_v60, %v1011_v37 }
 0x53c   :  { %v987_v32 = vmul.f32 %v1326_v31, %v985_v12  ;;  %vm992_vm10 = vweird.f32 %v1326_v31 }
 0x53d   :  { %vm993_vm13 = vmor %vm991_vm11, %vm992_vm10  ;;  %v1013_v56 = vadd.f32 %v1324_v60, %v1012_v52 }
 0x53e   :  { %v988_v39 = vsub.f32 1.0, %v987_v32 }
 0x53f   :  { %v1017_v20 = vsel %vm1016_vm2, %v1324_v60, %v1013_v56  ;;  %v1161_v56 = vpop.permute.xlu2 %1160 }
 0x540   :  { %v989_v49 = vmul.f32 %v1326_v31, %v988_v39  ;;  %v1022_v11 = vsel %vm1019_vm3, %v1021_v24, %v1017_v20  ;;  %v1180_v20 = vsel %vm199_vm12, %v1553_v40, %v1161_v56 }
 0x541   :  { %v1031_v28 = vsub.f32 1.0, %v1022_v11  ;;  %v1035_v41 = vmul.f32 %v1033_v23, %v1022_v11 }
 0x542   :  { %v990_v34 = vadd.f32 %v1326_v31, %v989_v49 }
 0x544   :  { %v994_v53 = vsel %vm993_vm13, %v1326_v31, %v990_v34  ;;  %vm1181_vm13 = vcmask 523264  }
 0x545   :  { %v999_v54 = vsel %vm996_vm14, %v998_v35, %v994_v53  ;;  %v1170_v53 = vpop.permute.xlu1 %1169  ;;  %vm1183_vm14 = vcmask 785408  }
 0x546   :  { %v1028_v57 = vmul.f32 %v1026_v36, %v999_v54  ;;  %v1185_v48 = vsel %vm199_vm12, %v1672_v29, %v1170_v53 }
 0x548   :  { %v1029_v16 = vadd.f32 %v1028_v57, %v1668_v14 }
 0x54a   :  { %1327 = vtanh.f32 %v1029_v16 }
 0x550   :  { %v1328_v55 = vpop.eup %1327 }
 0x551   :  { %v1032_v45 = vmul.f32 %v1328_v55, %v1031_v28 }
 0x553   :  { %v1697_v59 = vadd.f32 %v1035_v41, %v1032_v45 }
 0x555   :  { %v1038_v61 = vrot.slane %v1697_v59, 4  ;;  %v1156_v49 = vrot.slane %v1697_v59, 6 }
 0x557   :  { %1172 = vrot.lane.b32.xlu1 %v1038_v61, %s1398_s9  ;;  %1243 = vmatmul.msk.f32.vlgmr.msrb.gmra.mxu2 %vm199_vm12, %v1038_v61 }
 0x558   :  { %1244 = vmatmul.msk.f32.vlgmr.msrb.gmra.mxu3 %vm199_vm12, %v1038_v61  ;;  %1245 = vmatmul.msk.f32.vlgmr.msra.gmra.mxu0 %vm199_vm12, %v1038_v61 }
 0x55f   :  { %1166 = vrot.lane.b32.xlu1 %v1632_v58, %s1399_s10 }
 0x5c9   :  { %v1173_v54 = vpop.permute.xlu1 %1172 }
 0x5ca   :  { %v1186_v57 = vsel %vm1181_vm13, %v1185_v48, %v1173_v54 }
 0x5d1   :  { %v1167_v3 = vpop.permute.xlu1 %1166 }
 0x5d5   :  { %v1098_v18 = vpop.f32.mrf.mxu0 }
 0x5da   :  { %v1058_v62 = vpop.f32.mrf.mxu2 }
 0x5db   :  { %v1102_v63 = vrot.slane %v1058_v62, 2  ;;  %v1078_v1 = vpop.f32.mrf.mxu3 }
 0x5dc   :  { %v1125_v46 = vrot.slane %v1078_v1, 2 }
 0x5dd   :  { %v1104_v42 = vadd.f32 %v1102_v63, %v1655_v2 }
 0x5de   :  { %v1127_v4 = vadd.f32 %v1125_v46, %v1661_v5  ;;  %v1147_v5 = vadd.f32 %v1544_v0, %v1098_v18 }
 0x5df   :  { %v1246_v6 = vmul.f32 -1.442695, %v1104_v42 }
 0x5e0   :  { %v1247_v7 = vmul.f32 -1.442695, %v1127_v4  ;;  %v1149_v27 = vrot.slane %v1147_v5, 2 }
 0x5e1   :  { %1329 = vpow2.f32 %v1246_v6 }
 0x5e2   :  { %1331 = vpow2.f32 %v1247_v7 }
 0x5e7   :  { %v1330_v8 = vpop.eup %1329 }
 0x5e8   :  { %v1332_v9 = vpop.eup %1331  ;;  %v1108_v10 = vadd.f32 1.0, %v1330_v8 }
 0x5e9   :  { %v1131_v13 = vadd.f32 1.0, %v1332_v9 }
 0x5ea   :  { %1333 = vrcp.f32 %v1108_v10  ;;  %v1120_v19 = vand.u32 2147483648, %v1108_v10  ;;  %v1118_v22 = vand.u32 2147483647, %v1108_v10  ;;  %vm1114_vm5 = vweird.f32 %v1108_v10 }
 0x5eb   :  { %1335 = vrcp.f32 %v1131_v13  ;;  %v1143_v31 = vand.u32 2147483648, %v1131_v13  ;;  %vm1137_vm9 = vweird.f32 %v1131_v13  ;;  %v1141_v37 = vand.u32 2147483647, %v1131_v13 }
 0x5ec   :  { %v1121_v44 = vor.u32 1.1754944e-38, %v1120_v19  ;;  %vm1119_vm7 = vcmp.eq.f32.partialorder %v1118_v22, 8.507059e+37 }
 0x5ed   :  { %v1144_v39 = vor.u32 1.1754944e-38, %v1143_v31  ;;  %vm1142_vm11 = vcmp.eq.f32.partialorder %v1141_v37, 8.507059e+37 }
 0x5f0   :  { %v1334_v15 = vpop.eup %1333 }
 0x5f1   :  { %v1336_v58 = vpop.eup %1335  ;;  %v1110_v17 = vmul.f32 %v1334_v15, %v1108_v10  ;;  %vm1115_vm4 = vweird.f32 %v1334_v15 }
 0x5f2   :  { %v1133_v50 = vmul.f32 %v1336_v58, %v1131_v13  ;;  %vm1116_vm6 = vmor %vm1114_vm5, %vm1115_vm4  ;;  %vm1138_vm8 = vweird.f32 %v1336_v58 }
 0x5f3   :  { %v1111_v51 = vsub.f32 1.0, %v1110_v17  ;;  %vm1139_vm10 = vmor %vm1137_vm9, %vm1138_vm8 }
 0x5f4   :  { %v1134_v2 = vsub.f32 1.0, %v1133_v50 }
 0x5f5   :  { %v1112_v21 = vmul.f32 %v1334_v15, %v1111_v51 }
 0x5f6   :  { %v1135_v25 = vmul.f32 %v1336_v58, %v1134_v2 }
 0x5f7   :  { %v1113_v26 = vadd.f32 %v1334_v15, %v1112_v21 }
 0x5f8   :  { %v1136_v30 = vadd.f32 %v1336_v58, %v1135_v25 }
 0x5f9   :  { %v1117_v12 = vsel %vm1116_vm6, %v1334_v15, %v1113_v26 }
 0x5fa   :  { %v1122_v60 = vsel %vm1119_vm7, %v1121_v44, %v1117_v12  ;;  %v1140_v38 = vsel %vm1139_vm10, %v1336_v58, %v1136_v30 }
 0x5fb   :  { %v1151_v32 = vmul.f32 %v1149_v27, %v1122_v60  ;;  %v1145_v43 = vsel %vm1142_vm11, %v1144_v39, %v1140_v38 }
 0x5fc   :  { %v1154_v47 = vsub.f32 1.0, %v1145_v43  ;;  %v1158_v34 = vmul.f32 %v1156_v49, %v1145_v43 }
 0x5fd   :  { %v1152_v0 = vadd.f32 %v1151_v32, %v1668_v14  ;;  %v1164_v14 = vpop.permute.xlu0 %1163 }
 0x5fe   :  { %v1182_v11 = vsel %vm1181_vm13, %v1180_v20, %v1164_v14 }
 0x5ff   :  { %1337 = vtanh.f32 %v1152_v0  ;;  %v1184_v28 = vsel %vm1183_vm14, %v1182_v11, %v1167_v3 }
 0x605   :  { %v1338_v33 = vpop.eup %1337 }
 0x606   :  { %v1155_v52 = vmul.f32 %v1338_v33, %v1154_v47 }
 0x608   :  { %v1159_v35 = vadd.f32 %v1158_v34, %v1155_v52 }
 0x60a   :  { %v1176_v36 = vrot.slane %v1159_v35, 6 }
 0x60c   :  { %1177 = vrot.lane.b32.xlu2 %v1176_v36, %s1399_s10 }
 0x666   :  { %v1178_v16 = vpop.permute.xlu2 %1177 }
 0x667   :  { %v1187_v24 = vsel %vm1183_vm14, %v1186_v57, %v1178_v16 }
 0x668   :  { %v1190_v23 = vrot.slane %v1187_v24, 6 }
 0x66a   :  { %v1191_v55 = vsel %vm104_vm0, %v1184_v28, %v1190_v23 }
 0x66b   :  { %1193 = vst [vmem:[%s1725_s5] sm:$0xf] %v1191_v55 }
 0x66c   :  { %1198 = vsyncpa [#allocation3], 1 }
 0x66d   :  { %1199 = vsyncpa [#allocation5], 1 }

</bundles_post_ra>
